<compile_context>
chip_gen: v6e
topology: v6e:2x2x1
jax: 0.10.0
libtpu: 0.0.40
codegen_flags: <defaults>
</compile_context>

<pallas_src>
import functools

import jax
import jax.numpy as jnp
from jax.experimental import pallas as pl
from jax.experimental.pallas import tpu as pltpu

BN_EPS = 1e-5


# ---------------------------------------------------------------------------
# Fused Pallas kernel: one grid step = Nb images, both branches.
# ---------------------------------------------------------------------------
def _fused_kernel(x_ref, y_ref, m1_ref, m2_ref, m3_ref,
                  b1_ref, b2_ref, b3_ref, mo_ref, sh_ref,
                  o_ref, pad_ref):
    """Activations live in a (R, W*C) pad scratch in the matmul dtype.

    Pad layout (stride = H + 4 rows per slab, S = 2*Nb slabs):
        rows s*stride + [0,2)        zero height halo (top)
        rows s*stride + [2, 2+H)     activation rows 0..H-1 of slab s
        rows s*stride + [2+H, 4+H)   zero height halo (bottom)
    Slabs 0..Nb-1 are the x-branch images, slabs Nb..2Nb-1 the y-branch.
    Width taps / width halo are folded into the banded weights m*_ref[dy],
    so a 3x3 conv over ALL slabs is 3 contiguous-slice matmuls.
    Output row r of slab s lives at acc[s*stride + 1 + r].
    """
    Nb, H, WC = x_ref.shape
    S = 2 * Nb
    stride = H + 4
    R = S * stride                     # == pad_ref.shape[0]
    M = R - 2                          # matmul M (a few dead seam rows)
    mm = pad_ref.dtype                 # matmul dtype (bf16 default / f32 exact)

    # Zero only the halo rows (2 pair-aligned stores per slab).  Interior rows
    # are fully overwritten below; halos must be re-zeroed each step because
    # scratch is per-core under megacore grid sharding.
    z2 = jnp.zeros((2, WC), mm)
    for s in range(S):
        base = s * stride
        pad_ref[base:base + 2, :] = z2
        pad_ref[base + 2 + H:base + 4 + H, :] = z2

    def write_interior(s, val_f32):
        base = s * stride + 2
        pad_ref[base:base + H, :] = val_f32.astype(mm)   # single cast per conv

    def slab_rows(acc, s):
        start = s * stride + 1
        return acc[start:start + H]

    # Load both branches of all Nb images into the pad scratch.
    for i in range(Nb):
        write_interior(i, x_ref[i])
        write_interior(Nb + i, y_ref[i])

    def conv3x3_relu(m_ref, b_ref):
        # One (M, WC) x (WC, WCout) MXU matmul per vertical tap dy, covering
        # every slab (both branches, all Nb images) in a single call.
        acc = jnp.zeros((M, m_ref.shape[2]), jnp.float32)
        for dy in range(3):
            acc = acc + jnp.dot(pad_ref[dy:dy + M, :], m_ref[dy],
                                preferred_element_type=jnp.float32)
        return jnp.maximum(acc + b_ref[...], 0.0)        # seam rows are dead

    a1 = conv3x3_relu(m1_ref, b1_ref)                    # x1 / y1
    for s in range(S):
        write_interior(s, slab_rows(a1, s))
    a2 = conv3x3_relu(m2_ref, b2_ref)                    # x2 / y2
    s12 = a1 + a2                                        # conv3 input (f32)
    for s in range(S):
        write_interior(s, slab_rows(s12, s))
    a3 = conv3x3_relu(m3_ref, b3_ref)                    # x3 / y3
    tot = s12 + a3                                       # x1+x2+x3 per slab

    # Per image: abs diff of the two branches, 1x1 conv (+folded BN), ReLU.
    for i in range(Nb):
        d = jnp.abs(slab_rows(tot, i) - slab_rows(tot, Nb + i))
        z = jnp.dot(d.astype(mo_ref.dtype), mo_ref[...],
                    preferred_element_type=jnp.float32)
        o_ref[i] = jnp.maximum(z + sh_ref[...], 0.0)


# ---------------------------------------------------------------------------
# One-time host-side weight transforms (hoisted out of the forward call).
# ---------------------------------------------------------------------------
def _banded_conv_weights(w, W):
    """(3,3,C,Co) HWIO 3x3 weights -> (3, W*C, W*Co) per-dy banded matrices.

    M[dy, r*C+ci, c*Co+co] = w[dy, r-c+1, ci, co] when 0 <= r-c+1 < 3, else 0,
    so `flat_row @ M[dy]` performs the width part (with zero padding) of the
    conv for vertical tap dy.
    """
    C, Co = w.shape[2], w.shape[3]
    r = jnp.arange(W)[:, None]
    c = jnp.arange(W)[None, :]
    dx = r - c + 1                                        # (W, W)
    valid = (dx >= 0) & (dx < 3)
    blocks = w[:, jnp.clip(dx, 0, 2)]                     # (3, W, W, C, Co)
    blocks = jnp.where(valid[None, :, :, None, None], blocks, 0.0)
    return jnp.transpose(blocks, (0, 1, 3, 2, 4)).reshape(3, W * C, W * Co)


def prepare_weights(params, W, matmul_dtype=jnp.bfloat16):
    """Banded conv weights, tiled biases, and inference-mode BN folding.

    Call ONCE per parameter set and cache; the forward only consumes the
    returned dict (perf feedback: these O(W^2*C*Cout) gathers/krons used to
    run as XLA ops on every call).
    """
    Cin = params["w1"].shape[2]
    Cout = params["wo"].shape[-1]
    WC, WCo = W * Cin, W * Cout

    m1 = _banded_conv_weights(params["w1"], W).astype(matmul_dtype)
    m2 = _banded_conv_weights(params["w2"], W).astype(matmul_dtype)
    m3 = _banded_conv_weights(params["w3"], W).astype(matmul_dtype)
    b1 = jnp.tile(params["b1"], W).reshape(1, WC)
    b2 = jnp.tile(params["b2"], W).reshape(1, WC)
    b3 = jnp.tile(params["b3"], W).reshape(1, WC)

    # Fold inference-mode BatchNorm into the 1x1 conv.
    scale = params["bn_gamma"] * jax.lax.rsqrt(params["bn_var"] + BN_EPS)
    shift = params["bn_beta"] - params["bn_mean"] * scale
    wo_s = params["wo"] * scale[None, :]
    mo = jnp.kron(jnp.eye(W, dtype=wo_s.dtype), wo_s).astype(matmul_dtype)
    sh = jnp.tile(params["bo"] * scale + shift, W).reshape(1, WCo)

    return {"m1": m1, "m2": m2, "m3": m3, "b1": b1, "b2": b2, "b3": b3,
            "mo": mo, "sh": sh}


# ---------------------------------------------------------------------------
# Forward passes (NHWC-native and NCHW wrapper for PyTorch parity).
# ---------------------------------------------------------------------------
def _forward_nhwc_impl(prep, x_nhwc, y_nhwc, images_per_step):
    N, H, W, Cin = x_nhwc.shape
    WC = W * Cin
    WCo = prep["mo"].shape[-1]
    Cout = WCo // W
    mm_dtype = prep["m1"].dtype
    Nb = int(images_per_step)
    assert N % Nb == 0, (N, Nb)
    grid_n = N // Nb
    stride = H + 4
    R = 2 * Nb * stride

    # NHWC -> lane-dense (N, H, W*C) slabs (metadata-only reshape).
    x2 = x_nhwc.reshape(N, H, WC)
    y2 = y_nhwc.reshape(N, H, WC)

    rep2 = lambda n: (0, 0)
    rep3 = lambda n: (0, 0, 0)
    out2 = pl.pallas_call(
        _fused_kernel,
        out_shape=jax.ShapeDtypeStruct((N, H, WCo), jnp.float32),
        grid_spec=pltpu.PrefetchScalarGridSpec(
            num_scalar_prefetch=0,
            grid=(grid_n,),
            in_specs=[
                pl.BlockSpec((Nb, H, WC), lambda n: (n, 0, 0)),   # x slabs
                pl.BlockSpec((Nb, H, WC), lambda n: (n, 0, 0)),   # y slabs
                pl.BlockSpec((3, WC, WC), rep3),                  # m1
                pl.BlockSpec((3, WC, WC), rep3),                  # m2
                pl.BlockSpec((3, WC, WC), rep3),                  # m3
                pl.BlockSpec((1, WC), rep2),                      # b1
                pl.BlockSpec((1, WC), rep2),                      # b2
                pl.BlockSpec((1, WC), rep2),                      # b3
                pl.BlockSpec((WC, WCo), rep2),                    # mo (1x1+BN)
                pl.BlockSpec((1, WCo), rep2),                     # shift
            ],
            out_specs=pl.BlockSpec((Nb, H, WCo), lambda n: (n, 0, 0)),
            scratch_shapes=[pltpu.VMEM((R, WC), mm_dtype)],
        ),
        compiler_params=pltpu.CompilerParams(
            dimension_semantics=("parallel",),
            vmem_limit_bytes=32 * 1024 * 1024),
    )(x2, y2, prep["m1"], prep["m2"], prep["m3"],
      prep["b1"], prep["b2"], prep["b3"], prep["mo"], prep["sh"])

    return out2.reshape(N, H, W, Cout)


@functools.partial(jax.jit, static_argnames=("images_per_step",))
def densecat_cat_diff_forward_nhwc(prep, x_nhwc, y_nhwc, images_per_step=1):
    """NHWC in / NHWC out: no wrapper relayouts."""
    return _forward_nhwc_impl(prep, x_nhwc, y_nhwc, images_per_step)


@functools.partial(jax.jit, static_argnames=("images_per_step",))
def densecat_cat_diff_forward(prep, x_nchw, y_nchw, images_per_step=1):
    """NCHW in / NCHW out wrapper matching the PyTorch module interface."""
    x = jnp.transpose(x_nchw, (0, 2, 3, 1))
    y = jnp.transpose(y_nchw, (0, 2, 3, 1))
    out = _forward_nhwc_impl(prep, x, y, images_per_step)
    return jnp.transpose(out, (0, 3, 1, 2))


# ---------------------------------------------------------------------------
# Parameters (PyTorch-style init) and pure-JAX reference for validation.
# ---------------------------------------------------------------------------
def init_params(key, in_chn, out_chn):
    ks = jax.random.split(key, 12)

    def conv_w(k, kh, kw, ci, co):
        bound = 1.0 / float(jnp.sqrt(kh * kw * ci))
        return jax.random.uniform(k, (kh, kw, ci, co), jnp.float32, -bound, bound)

    def bias(k, c, fan_in):
        bound = 1.0 / float(jnp.sqrt(fan_in))
        return jax.random.uniform(k, (c,), jnp.float32, -bound, bound)

    return {
        "w1": conv_w(ks[0], 3, 3, in_chn, in_chn),
        "b1": bias(ks[1], in_chn, 9 * in_chn),
        "w2": conv_w(ks[2], 3, 3, in_chn, in_chn),
        "b2": bias(ks[3], in_chn, 9 * in_chn),
        "w3": conv_w(ks[4], 3, 3, in_chn, in_chn),
        "b3": bias(ks[5], in_chn, 9 * in_chn),
        "wo": conv_w(ks[6], 1, 1, in_chn, out_chn).reshape(in_chn, out_chn),
        "bo": bias(ks[7], out_chn, in_chn),
        "bn_gamma": 1.0 + 0.1 * jax.random.uniform(ks[8], (out_chn,), jnp.float32),
        "bn_beta": 0.1 * jax.random.normal(ks[9], (out_chn,), jnp.float32),
        "bn_mean": 0.1 * jax.random.normal(ks[10], (out_chn,), jnp.float32),
        "bn_var": 0.5 + jax.random.uniform(ks[11], (out_chn,), jnp.float32),
    }


def reference_forward(params, x_nchw, y_nchw):
    x = jnp.transpose(x_nchw, (0, 2, 3, 1))
    y = jnp.transpose(y_nchw, (0, 2, 3, 1))

    def conv3(a, w, b):
        z = jax.lax.conv_general_dilated(
            a, w, window_strides=(1, 1), padding="SAME",
            dimension_numbers=("NHWC", "HWIO", "NHWC"))
        return jax.nn.relu(z + b)

    x1 = conv3(x, params["w1"], params["b1"])
    x2 = conv3(x1, params["w2"], params["b2"])
    x3 = conv3(x2 + x1, params["w3"], params["b3"])
    y1 = conv3(y, params["w1"], params["b1"])
    y2 = conv3(y1, params["w2"], params["b2"])
    y3 = conv3(y2 + y1, params["w3"], params["b3"])
    d = jnp.abs(x1 + x2 + x3 - y1 - y2 - y3)
    z = jnp.einsum("nhwc,co->nhwo", d, params["wo"]) + params["bo"]
    scale = params["bn_gamma"] * jax.lax.rsqrt(params["bn_var"] + BN_EPS)
    shift = params["bn_beta"] - params["bn_mean"] * scale
    out = jax.nn.relu(z * scale + shift)
    return jnp.transpose(out, (0, 3, 1, 2))


if __name__ == "__main__":
    N, C_IN, C_OUT, H, W = 2, 4, 8, 16, 16
    key = jax.random.PRNGKey(0)
    kx, ky, kp = jax.random.split(key, 3)
    x = jax.random.normal(kx, (N, C_IN, H, W), jnp.float32)   # NCHW like PyTorch
    y = jax.random.normal(ky, (N, C_IN, H, W), jnp.float32)
    params = init_params(kp, C_IN, C_OUT)

    ref = reference_forward(params, x, y)

    # Exactness check: f32 MXU operands + f32 pad scratch, one image per step.
    prep_f32 = prepare_weights(params, W, matmul_dtype=jnp.float32)
    out_f32 = jax.block_until_ready(densecat_cat_diff_forward(prep_f32, x, y))
    assert out_f32.shape == (N, C_OUT, H, W), out_f32.shape
    err_f32 = float(jnp.max(jnp.abs(out_f32 - ref)))
    assert jnp.allclose(out_f32, ref, atol=1e-4, rtol=1e-4), err_f32

    # Batch-folded variant (all N images in one grid step) is also exact.
    out_f32_b = jax.block_until_ready(
        densecat_cat_diff_forward(prep_f32, x, y, images_per_step=N))
    err_f32_b = float(jnp.max(jnp.abs(out_f32_b - ref)))
    assert jnp.allclose(out_f32_b, ref, atol=1e-4, rtol=1e-4), err_f32_b

    # Default perf path: bf16 MXU operands + bf16 pad scratch (f32 accum).
    prep = prepare_weights(params, W)                      # bf16, prepared once
    out_bf16 = jax.block_until_ready(densecat_cat_diff_forward(prep, x, y))
    assert out_bf16.shape == (N, C_OUT, H, W), out_bf16.shape
    err_bf16 = float(jnp.max(jnp.abs(out_bf16 - ref)))
    assert jnp.allclose(out_bf16, ref, atol=5e-2, rtol=5e-2), err_bf16

    print("KERNEL_OK")
</pallas_src>

<mosaic_0001>
module attributes {stable_mosaic.version = 11 : i64} {
  func.func @_fused_kernel(%arg0: i32, %arg1: memref<1x16x64xf32, #tpu.memory_space<vmem>>, %arg2: memref<1x16x64xf32, #tpu.memory_space<vmem>>, %arg3: memref<3x64x64xf32, #tpu.memory_space<vmem>>, %arg4: memref<3x64x64xf32, #tpu.memory_space<vmem>>, %arg5: memref<3x64x64xf32, #tpu.memory_space<vmem>>, %arg6: memref<1x64xf32, #tpu.memory_space<vmem>>, %arg7: memref<1x64xf32, #tpu.memory_space<vmem>>, %arg8: memref<1x64xf32, #tpu.memory_space<vmem>>, %arg9: memref<64x128xf32, #tpu.memory_space<vmem>>, %arg10: memref<1x128xf32, #tpu.memory_space<vmem>>, %arg11: memref<1x16x128xf32, #tpu.memory_space<vmem>>, %arg12: memref<40x64xf32, #tpu.memory_space<vmem>>) attributes {dimension_semantics = [#tpu.dimension_semantics<parallel>], iteration_bounds = array<i64: 2>, scalar_prefetch = 0 : i64, scratch_operands = 1 : i64, tpu.core_type = #tpu.core_type<tc>, window_params = [{transform_indices = @transform_0, window_bounds = array<i64: 1, 16, 64>}, {transform_indices = @transform_1, window_bounds = array<i64: 1, 16, 64>}, {pipeline_mode = #tpu.pipeline_mode<synchronous>, transform_indices = @transform_2, window_bounds = array<i64: 3, 64, 64>}, {pipeline_mode = #tpu.pipeline_mode<synchronous>, transform_indices = @transform_3, window_bounds = array<i64: 3, 64, 64>}, {pipeline_mode = #tpu.pipeline_mode<synchronous>, transform_indices = @transform_4, window_bounds = array<i64: 3, 64, 64>}, {pipeline_mode = #tpu.pipeline_mode<synchronous>, transform_indices = @transform_5, window_bounds = array<i64: 1, 64>}, {pipeline_mode = #tpu.pipeline_mode<synchronous>, transform_indices = @transform_6, window_bounds = array<i64: 1, 64>}, {pipeline_mode = #tpu.pipeline_mode<synchronous>, transform_indices = @transform_7, window_bounds = array<i64: 1, 64>}, {pipeline_mode = #tpu.pipeline_mode<synchronous>, transform_indices = @transform_8, window_bounds = array<i64: 64, 128>}, {pipeline_mode = #tpu.pipeline_mode<synchronous>, transform_indices = @transform_9, window_bounds = array<i64: 1, 128>}, {transform_indices = @transform_10, window_bounds = array<i64: 1, 16, 128>}]} {
    %cst = arith.constant 0.000000e+00 : f32
    %0 = vector.broadcast %cst : f32 to vector<2x64xf32>
    %c0 = arith.constant 0 : index
    %c0_0 = arith.constant 0 : index
    %1 = vector.load %arg12[%c0, %c0_0] : memref<40x64xf32, #tpu.memory_space<vmem>>, vector<2x64xf32>
    tpu.vector_store %arg12[%c0, %c0_0], %0 {strides = array<i32>} : memref<40x64xf32, #tpu.memory_space<vmem>>, vector<2x64xf32>,
    %c18 = arith.constant 18 : index
    %c0_1 = arith.constant 0 : index
    %2 = vector.load %arg12[%c18, %c0_1] : memref<40x64xf32, #tpu.memory_space<vmem>>, vector<2x64xf32>
    tpu.vector_store %arg12[%c18, %c0_1], %0 {strides = array<i32>} : memref<40x64xf32, #tpu.memory_space<vmem>>, vector<2x64xf32>,
    %c20 = arith.constant 20 : index
    %c0_2 = arith.constant 0 : index
    %3 = vector.load %arg12[%c20, %c0_2] : memref<40x64xf32, #tpu.memory_space<vmem>>, vector<2x64xf32>
    tpu.vector_store %arg12[%c20, %c0_2], %0 {strides = array<i32>} : memref<40x64xf32, #tpu.memory_space<vmem>>, vector<2x64xf32>,
    %c38 = arith.constant 38 : index
    %c0_3 = arith.constant 0 : index
    %4 = vector.load %arg12[%c38, %c0_3] : memref<40x64xf32, #tpu.memory_space<vmem>>, vector<2x64xf32>
    tpu.vector_store %arg12[%c38, %c0_3], %0 {strides = array<i32>} : memref<40x64xf32, #tpu.memory_space<vmem>>, vector<2x64xf32>,
    %c0_4 = arith.constant 0 : index
    %c0_5 = arith.constant 0 : index
    %c0_6 = arith.constant 0 : index
    %5 = vector.load %arg1[%c0_4, %c0_5, %c0_6] : memref<1x16x64xf32, #tpu.memory_space<vmem>>, vector<1x16x64xf32>
    %6 = vector.shape_cast %5 : vector<1x16x64xf32> to vector<16x64xf32>
    %c2 = arith.constant 2 : index
    %c0_7 = arith.constant 0 : index
    %7 = vector.load %arg12[%c2, %c0_7] : memref<40x64xf32, #tpu.memory_space<vmem>>, vector<16x64xf32>
    tpu.vector_store %arg12[%c2, %c0_7], %6 {strides = array<i32>} : memref<40x64xf32, #tpu.memory_space<vmem>>, vector<16x64xf32>,
    %c0_8 = arith.constant 0 : index
    %c0_9 = arith.constant 0 : index
    %c0_10 = arith.constant 0 : index
    %8 = vector.load %arg2[%c0_8, %c0_9, %c0_10] : memref<1x16x64xf32, #tpu.memory_space<vmem>>, vector<1x16x64xf32>
    %9 = vector.shape_cast %8 : vector<1x16x64xf32> to vector<16x64xf32>
    %c22 = arith.constant 22 : index
    %c0_11 = arith.constant 0 : index
    %10 = vector.load %arg12[%c22, %c0_11] : memref<40x64xf32, #tpu.memory_space<vmem>>, vector<16x64xf32>
    tpu.vector_store %arg12[%c22, %c0_11], %9 {strides = array<i32>} : memref<40x64xf32, #tpu.memory_space<vmem>>, vector<16x64xf32>,
    %cst_12 = arith.constant 0.000000e+00 : f32
    %11 = vector.broadcast %cst_12 : f32 to vector<38x64xf32>
    %c0_13 = arith.constant 0 : index
    %c0_14 = arith.constant 0 : index
    %12 = vector.load %arg12[%c0_13, %c0_14] : memref<40x64xf32, #tpu.memory_space<vmem>>, vector<38x64xf32>
    %c0_15 = arith.constant 0 : index
    %c0_16 = arith.constant 0 : index
    %c0_17 = arith.constant 0 : index
    %13 = vector.load %arg3[%c0_15, %c0_16, %c0_17] : memref<3x64x64xf32, #tpu.memory_space<vmem>>, vector<1x64x64xf32>
    %14 = vector.shape_cast %13 : vector<1x64x64xf32> to vector<64x64xf32>
    %cst_18 = arith.constant dense<0.000000e+00> : vector<38x64xf32>
    %15 = tpu.matmul %12, %14, %cst_18 {dimension_numbers = #tpu.dot_dimension_numbers<[1], [0], [0], [1], [0, 0, 1, 1], [], []>} : vector<38x64xf32>, vector<64x64xf32>, vector<38x64xf32> -> vector<38x64xf32>
    %16 = arith.addf %11, %15 : vector<38x64xf32>
    %c1 = arith.constant 1 : index
    %c0_19 = arith.constant 0 : index
    %17 = vector.load %arg12[%c1, %c0_19] : memref<40x64xf32, #tpu.memory_space<vmem>>, vector<38x64xf32>
    %c1_20 = arith.constant 1 : index
    %c0_21 = arith.constant 0 : index
    %c0_22 = arith.constant 0 : index
    %18 = vector.load %arg3[%c1_20, %c0_21, %c0_22] : memref<3x64x64xf32, #tpu.memory_space<vmem>>, vector<1x64x64xf32>
    %19 = vector.shape_cast %18 : vector<1x64x64xf32> to vector<64x64xf32>
    %cst_23 = arith.constant dense<0.000000e+00> : vector<38x64xf32>
    %20 = tpu.matmul %17, %19, %cst_23 {dimension_numbers = #tpu.dot_dimension_numbers<[1], [0], [0], [1], [0, 0, 1, 1], [], []>} : vector<38x64xf32>, vector<64x64xf32>, vector<38x64xf32> -> vector<38x64xf32>
    %21 = arith.addf %16, %20 : vector<38x64xf32>
    %c2_24 = arith.constant 2 : index
    %c0_25 = arith.constant 0 : index
    %22 = vector.load %arg12[%c2_24, %c0_25] : memref<40x64xf32, #tpu.memory_space<vmem>>, vector<38x64xf32>
    %c2_26 = arith.constant 2 : index
    %c0_27 = arith.constant 0 : index
    %c0_28 = arith.constant 0 : index
    %23 = vector.load %arg3[%c2_26, %c0_27, %c0_28] : memref<3x64x64xf32, #tpu.memory_space<vmem>>, vector<1x64x64xf32>
    %24 = vector.shape_cast %23 : vector<1x64x64xf32> to vector<64x64xf32>
    %cst_29 = arith.constant dense<0.000000e+00> : vector<38x64xf32>
    %25 = tpu.matmul %22, %24, %cst_29 {dimension_numbers = #tpu.dot_dimension_numbers<[1], [0], [0], [1], [0, 0, 1, 1], [], []>} : vector<38x64xf32>, vector<64x64xf32>, vector<38x64xf32> -> vector<38x64xf32>
    %26 = arith.addf %21, %25 : vector<38x64xf32>
    %c0_30 = arith.constant 0 : index
    %c0_31 = arith.constant 0 : index
    %27 = vector.load %arg6[%c0_30, %c0_31] : memref<1x64xf32, #tpu.memory_space<vmem>>, vector<1x64xf32>
    %28 = vector.broadcast %27 : vector<1x64xf32> to vector<38x64xf32>
    %29 = arith.addf %26, %28 : vector<38x64xf32>
    %cst_32 = arith.constant 0.000000e+00 : f32
    %30 = vector.broadcast %cst_32 : f32 to vector<38x64xf32>
    %31 = arith.maximumf %29, %30 : vector<38x64xf32>
    %32 = vector.extract_strided_slice %31 {offsets = [1, 0], sizes = [16, 64], strides = [1, 1]} : vector<38x64xf32> to vector<16x64xf32>
    %c2_33 = arith.constant 2 : index
    %c0_34 = arith.constant 0 : index
    %33 = vector.load %arg12[%c2_33, %c0_34] : memref<40x64xf32, #tpu.memory_space<vmem>>, vector<16x64xf32>
    tpu.vector_store %arg12[%c2_33, %c0_34], %32 {strides = array<i32>} : memref<40x64xf32, #tpu.memory_space<vmem>>, vector<16x64xf32>,
    %34 = vector.extract_strided_slice %31 {offsets = [21, 0], sizes = [16, 64], strides = [1, 1]} : vector<38x64xf32> to vector<16x64xf32>
    %c22_35 = arith.constant 22 : index
    %c0_36 = arith.constant 0 : index
    %35 = vector.load %arg12[%c22_35, %c0_36] : memref<40x64xf32, #tpu.memory_space<vmem>>, vector<16x64xf32>
    tpu.vector_store %arg12[%c22_35, %c0_36], %34 {strides = array<i32>} : memref<40x64xf32, #tpu.memory_space<vmem>>, vector<16x64xf32>,
    %cst_37 = arith.constant 0.000000e+00 : f32
    %36 = vector.broadcast %cst_37 : f32 to vector<38x64xf32>
    %c0_38 = arith.constant 0 : index
    %c0_39 = arith.constant 0 : index
    %37 = vector.load %arg12[%c0_38, %c0_39] : memref<40x64xf32, #tpu.memory_space<vmem>>, vector<38x64xf32>
    %c0_40 = arith.constant 0 : index
    %c0_41 = arith.constant 0 : index
    %c0_42 = arith.constant 0 : index
    %38 = vector.load %arg4[%c0_40, %c0_41, %c0_42] : memref<3x64x64xf32, #tpu.memory_space<vmem>>, vector<1x64x64xf32>
    %39 = vector.shape_cast %38 : vector<1x64x64xf32> to vector<64x64xf32>
    %cst_43 = arith.constant dense<0.000000e+00> : vector<38x64xf32>
    %40 = tpu.matmul %37, %39, %cst_43 {dimension_numbers = #tpu.dot_dimension_numbers<[1], [0], [0], [1], [0, 0, 1, 1], [], []>} : vector<38x64xf32>, vector<64x64xf32>, vector<38x64xf32> -> vector<38x64xf32>
    %41 = arith.addf %36, %40 : vector<38x64xf32>
    %c1_44 = arith.constant 1 : index
    %c0_45 = arith.constant 0 : index
    %42 = vector.load %arg12[%c1_44, %c0_45] : memref<40x64xf32, #tpu.memory_space<vmem>>, vector<38x64xf32>
    %c1_46 = arith.constant 1 : index
    %c0_47 = arith.constant 0 : index
    %c0_48 = arith.constant 0 : index
    %43 = vector.load %arg4[%c1_46, %c0_47, %c0_48] : memref<3x64x64xf32, #tpu.memory_space<vmem>>, vector<1x64x64xf32>
    %44 = vector.shape_cast %43 : vector<1x64x64xf32> to vector<64x64xf32>
    %cst_49 = arith.constant dense<0.000000e+00> : vector<38x64xf32>
    %45 = tpu.matmul %42, %44, %cst_49 {dimension_numbers = #tpu.dot_dimension_numbers<[1], [0], [0], [1], [0, 0, 1, 1], [], []>} : vector<38x64xf32>, vector<64x64xf32>, vector<38x64xf32> -> vector<38x64xf32>
    %46 = arith.addf %41, %45 : vector<38x64xf32>
    %c2_50 = arith.constant 2 : index
    %c0_51 = arith.constant 0 : index
    %47 = vector.load %arg12[%c2_50, %c0_51] : memref<40x64xf32, #tpu.memory_space<vmem>>, vector<38x64xf32>
    %c2_52 = arith.constant 2 : index
    %c0_53 = arith.constant 0 : index
    %c0_54 = arith.constant 0 : index
    %48 = vector.load %arg4[%c2_52, %c0_53, %c0_54] : memref<3x64x64xf32, #tpu.memory_space<vmem>>, vector<1x64x64xf32>
    %49 = vector.shape_cast %48 : vector<1x64x64xf32> to vector<64x64xf32>
    %cst_55 = arith.constant dense<0.000000e+00> : vector<38x64xf32>
    %50 = tpu.matmul %47, %49, %cst_55 {dimension_numbers = #tpu.dot_dimension_numbers<[1], [0], [0], [1], [0, 0, 1, 1], [], []>} : vector<38x64xf32>, vector<64x64xf32>, vector<38x64xf32> -> vector<38x64xf32>
    %51 = arith.addf %46, %50 : vector<38x64xf32>
    %c0_56 = arith.constant 0 : index
    %c0_57 = arith.constant 0 : index
    %52 = vector.load %arg7[%c0_56, %c0_57] : memref<1x64xf32, #tpu.memory_space<vmem>>, vector<1x64xf32>
    %53 = vector.broadcast %52 : vector<1x64xf32> to vector<38x64xf32>
    %54 = arith.addf %51, %53 : vector<38x64xf32>
    %cst_58 = arith.constant 0.000000e+00 : f32
    %55 = vector.broadcast %cst_58 : f32 to vector<38x64xf32>
    %56 = arith.maximumf %54, %55 : vector<38x64xf32>
    %57 = arith.addf %31, %56 : vector<38x64xf32>
    %58 = vector.extract_strided_slice %57 {offsets = [1, 0], sizes = [16, 64], strides = [1, 1]} : vector<38x64xf32> to vector<16x64xf32>
    %c2_59 = arith.constant 2 : index
    %c0_60 = arith.constant 0 : index
    %59 = vector.load %arg12[%c2_59, %c0_60] : memref<40x64xf32, #tpu.memory_space<vmem>>, vector<16x64xf32>
    tpu.vector_store %arg12[%c2_59, %c0_60], %58 {strides = array<i32>} : memref<40x64xf32, #tpu.memory_space<vmem>>, vector<16x64xf32>,
    %60 = vector.extract_strided_slice %57 {offsets = [21, 0], sizes = [16, 64], strides = [1, 1]} : vector<38x64xf32> to vector<16x64xf32>
    %c22_61 = arith.constant 22 : index
    %c0_62 = arith.constant 0 : index
    %61 = vector.load %arg12[%c22_61, %c0_62] : memref<40x64xf32, #tpu.memory_space<vmem>>, vector<16x64xf32>
    tpu.vector_store %arg12[%c22_61, %c0_62], %60 {strides = array<i32>} : memref<40x64xf32, #tpu.memory_space<vmem>>, vector<16x64xf32>,
    %cst_63 = arith.constant 0.000000e+00 : f32
    %62 = vector.broadcast %cst_63 : f32 to vector<38x64xf32>
    %c0_64 = arith.constant 0 : index
    %c0_65 = arith.constant 0 : index
    %63 = vector.load %arg12[%c0_64, %c0_65] : memref<40x64xf32, #tpu.memory_space<vmem>>, vector<38x64xf32>
    %c0_66 = arith.constant 0 : index
    %c0_67 = arith.constant 0 : index
    %c0_68 = arith.constant 0 : index
    %64 = vector.load %arg5[%c0_66, %c0_67, %c0_68] : memref<3x64x64xf32, #tpu.memory_space<vmem>>, vector<1x64x64xf32>
    %65 = vector.shape_cast %64 : vector<1x64x64xf32> to vector<64x64xf32>
    %cst_69 = arith.constant dense<0.000000e+00> : vector<38x64xf32>
    %66 = tpu.matmul %63, %65, %cst_69 {dimension_numbers = #tpu.dot_dimension_numbers<[1], [0], [0], [1], [0, 0, 1, 1], [], []>} : vector<38x64xf32>, vector<64x64xf32>, vector<38x64xf32> -> vector<38x64xf32>
    %67 = arith.addf %62, %66 : vector<38x64xf32>
    %c1_70 = arith.constant 1 : index
    %c0_71 = arith.constant 0 : index
    %68 = vector.load %arg12[%c1_70, %c0_71] : memref<40x64xf32, #tpu.memory_space<vmem>>, vector<38x64xf32>
    %c1_72 = arith.constant 1 : index
    %c0_73 = arith.constant 0 : index
    %c0_74 = arith.constant 0 : index
    %69 = vector.load %arg5[%c1_72, %c0_73, %c0_74] : memref<3x64x64xf32, #tpu.memory_space<vmem>>, vector<1x64x64xf32>
    %70 = vector.shape_cast %69 : vector<1x64x64xf32> to vector<64x64xf32>
    %cst_75 = arith.constant dense<0.000000e+00> : vector<38x64xf32>
    %71 = tpu.matmul %68, %70, %cst_75 {dimension_numbers = #tpu.dot_dimension_numbers<[1], [0], [0], [1], [0, 0, 1, 1], [], []>} : vector<38x64xf32>, vector<64x64xf32>, vector<38x64xf32> -> vector<38x64xf32>
    %72 = arith.addf %67, %71 : vector<38x64xf32>
    %c2_76 = arith.constant 2 : index
    %c0_77 = arith.constant 0 : index
    %73 = vector.load %arg12[%c2_76, %c0_77] : memref<40x64xf32, #tpu.memory_space<vmem>>, vector<38x64xf32>
    %c2_78 = arith.constant 2 : index
    %c0_79 = arith.constant 0 : index
    %c0_80 = arith.constant 0 : index
    %74 = vector.load %arg5[%c2_78, %c0_79, %c0_80] : memref<3x64x64xf32, #tpu.memory_space<vmem>>, vector<1x64x64xf32>
    %75 = vector.shape_cast %74 : vector<1x64x64xf32> to vector<64x64xf32>
    %cst_81 = arith.constant dense<0.000000e+00> : vector<38x64xf32>
    %76 = tpu.matmul %73, %75, %cst_81 {dimension_numbers = #tpu.dot_dimension_numbers<[1], [0], [0], [1], [0, 0, 1, 1], [], []>} : vector<38x64xf32>, vector<64x64xf32>, vector<38x64xf32> -> vector<38x64xf32>
    %77 = arith.addf %72, %76 : vector<38x64xf32>
    %c0_82 = arith.constant 0 : index
    %c0_83 = arith.constant 0 : index
    %78 = vector.load %arg8[%c0_82, %c0_83] : memref<1x64xf32, #tpu.memory_space<vmem>>, vector<1x64xf32>
    %79 = vector.broadcast %78 : vector<1x64xf32> to vector<38x64xf32>
    %80 = arith.addf %77, %79 : vector<38x64xf32>
    %cst_84 = arith.constant 0.000000e+00 : f32
    %81 = vector.broadcast %cst_84 : f32 to vector<38x64xf32>
    %82 = arith.maximumf %80, %81 : vector<38x64xf32>
    %83 = arith.addf %57, %82 : vector<38x64xf32>
    %84 = vector.extract_strided_slice %83 {offsets = [1, 0], sizes = [16, 64], strides = [1, 1]} : vector<38x64xf32> to vector<16x64xf32>
    %85 = vector.extract_strided_slice %83 {offsets = [21, 0], sizes = [16, 64], strides = [1, 1]} : vector<38x64xf32> to vector<16x64xf32>
    %86 = arith.subf %84, %85 : vector<16x64xf32>
    %87 = math.absf %86 : vector<16x64xf32>
    %c0_85 = arith.constant 0 : index
    %c0_86 = arith.constant 0 : index
    %88 = vector.load %arg9[%c0_85, %c0_86] : memref<64x128xf32, #tpu.memory_space<vmem>>, vector<64x128xf32>
    %cst_87 = arith.constant dense<0.000000e+00> : vector<16x128xf32>
    %89 = tpu.matmul %87, %88, %cst_87 {dimension_numbers = #tpu.dot_dimension_numbers<[1], [0], [0], [1], [0, 0, 1, 1], [], []>} : vector<16x64xf32>, vector<64x128xf32>, vector<16x128xf32> -> vector<16x128xf32>
    %c0_88 = arith.constant 0 : index
    %c0_89 = arith.constant 0 : index
    %90 = vector.load %arg10[%c0_88, %c0_89] : memref<1x128xf32, #tpu.memory_space<vmem>>, vector<1x128xf32>
    %91 = vector.broadcast %90 : vector<1x128xf32> to vector<16x128xf32>
    %92 = arith.addf %89, %91 : vector<16x128xf32>
    %cst_90 = arith.constant 0.000000e+00 : f32
    %93 = vector.broadcast %cst_90 : f32 to vector<16x128xf32>
    %94 = arith.maximumf %92, %93 : vector<16x128xf32>
    %c0_91 = arith.constant 0 : index
    %c0_92 = arith.constant 0 : index
    %c0_93 = arith.constant 0 : index
    %95 = vector.load %arg11[%c0_91, %c0_92, %c0_93] : memref<1x16x128xf32, #tpu.memory_space<vmem>>, vector<1x16x128xf32>
    %96 = vector.shape_cast %95 : vector<1x16x128xf32> to vector<16x128xf32>
    %97 = vector.shape_cast %94 : vector<16x128xf32> to vector<1x16x128xf32>
    tpu.vector_store %arg11[%c0_91, %c0_92, %c0_93], %97 {strides = array<i32>} : memref<1x16x128xf32, #tpu.memory_space<vmem>>, vector<1x16x128xf32>,
    return
  }
  func.func @transform_0(%arg0: i32) -> (i32, i32, i32) {
    %c0_i32 = arith.constant 0 : i32
    %c0_i32_0 = arith.constant 0 : i32
    %c0_i32_1 = arith.constant 0 : i32
    return %arg0, %c0_i32, %c0_i32_0 : i32, i32, i32
  }
  func.func @transform_1(%arg0: i32) -> (i32, i32, i32) {
    %c0_i32 = arith.constant 0 : i32
    %c0_i32_0 = arith.constant 0 : i32
    %c0_i32_1 = arith.constant 0 : i32
    return %arg0, %c0_i32, %c0_i32_0 : i32, i32, i32
  }
  func.func @transform_2(%arg0: i32) -> (i32, i32, i32) {
    %c0_i32 = arith.constant 0 : i32
    %c0_i32_0 = arith.constant 0 : i32
    %c0_i32_1 = arith.constant 0 : i32
    %c0_i32_2 = arith.constant 0 : i32
    return %c0_i32, %c0_i32_0, %c0_i32_1 : i32, i32, i32
  }
  func.func @transform_3(%arg0: i32) -> (i32, i32, i32) {
    %c0_i32 = arith.constant 0 : i32
    %c0_i32_0 = arith.constant 0 : i32
    %c0_i32_1 = arith.constant 0 : i32
    %c0_i32_2 = arith.constant 0 : i32
    return %c0_i32, %c0_i32_0, %c0_i32_1 : i32, i32, i32
  }
  func.func @transform_4(%arg0: i32) -> (i32, i32, i32) {
    %c0_i32 = arith.constant 0 : i32
    %c0_i32_0 = arith.constant 0 : i32
    %c0_i32_1 = arith.constant 0 : i32
    %c0_i32_2 = arith.constant 0 : i32
    return %c0_i32, %c0_i32_0, %c0_i32_1 : i32, i32, i32
  }
  func.func @transform_5(%arg0: i32) -> (i32, i32) {
    %c0_i32 = arith.constant 0 : i32
    %c0_i32_0 = arith.constant 0 : i32
    %c0_i32_1 = arith.constant 0 : i32
    return %c0_i32, %c0_i32_0 : i32, i32
  }
  func.func @transform_6(%arg0: i32) -> (i32, i32) {
    %c0_i32 = arith.constant 0 : i32
    %c0_i32_0 = arith.constant 0 : i32
    %c0_i32_1 = arith.constant 0 : i32
    return %c0_i32, %c0_i32_0 : i32, i32
  }
  func.func @transform_7(%arg0: i32) -> (i32, i32) {
    %c0_i32 = arith.constant 0 : i32
    %c0_i32_0 = arith.constant 0 : i32
    %c0_i32_1 = arith.constant 0 : i32
    return %c0_i32, %c0_i32_0 : i32, i32
  }
  func.func @transform_8(%arg0: i32) -> (i32, i32) {
    %c0_i32 = arith.constant 0 : i32
    %c0_i32_0 = arith.constant 0 : i32
    %c0_i32_1 = arith.constant 0 : i32
    return %c0_i32, %c0_i32_0 : i32, i32
  }
  func.func @transform_9(%arg0: i32) -> (i32, i32) {
    %c0_i32 = arith.constant 0 : i32
    %c0_i32_0 = arith.constant 0 : i32
    %c0_i32_1 = arith.constant 0 : i32
    return %c0_i32, %c0_i32_0 : i32, i32
  }
  func.func @transform_10(%arg0: i32) -> (i32, i32, i32) {
    %c0_i32 = arith.constant 0 : i32
    %c0_i32_0 = arith.constant 0 : i32
    %c0_i32_1 = arith.constant 0 : i32
    return %arg0, %c0_i32, %c0_i32_0 : i32, i32, i32
  }
}

</mosaic_0001>

<bundles_post_ra>
// kernel: densecat_cat_diff_forward.1
= control target key start
LH: loop header
LB: loop body
LE: loop exit
PB: predicated region body
PF: predicated region fallthrough
CT: control target
= control target key end

     0   :  { %s2361_s13 = smov 0   ;;  %s2921_s0 = inlined_call_operand.vmem [shape: f32[2,16,64], index: 0, kind: input, shape index: {}]   ;;  %s2922_s1 = inlined_call_operand.vmem [shape: f32[2,16,64], index: 1, kind: input, shape index: {}]   ;;  %s2923_s2 = inlined_call_operand.vmem [shape: f32[3,64,64], index: 2, kind: input, shape index: {}]   ;;  %s2924_s3 = inlined_call_operand.vmem [shape: f32[3,64,64], index: 3, kind: input, shape index: {}]   ;;  %s2925_s4 = inlined_call_operand.vmem [shape: f32[3,64,64], index: 4, kind: input, shape index: {}]   ;;  %s2926_s5 = inlined_call_operand.vmem [shape: f32[1,64], index: 5, kind: input, shape index: {}]   ;;  %s2927_s6 = inlined_call_operand.vmem [shape: f32[1,64], index: 6, kind: input, shape index: {}]   ;;  %s2928_s7 = inlined_call_operand.vmem [shape: f32[1,64], index: 7, kind: input, shape index: {}]   ;;  %s2929_s8 = inlined_call_operand.vmem [shape: f32[64,128], index: 8, kind: input, shape index: {}]   ;;  %s2930_s9 = inlined_call_operand.vmem [shape: f32[1,128], index: 9, kind: input, shape index: {}]   ;;  %s2931_s10 = inlined_call_operand.vmem [shape: f32[2,16,128], index: 10, kind: output, shape index: {}]  }
   0x1 LB: > { %s1746_s14 = sadd.s32 4294967295, %s2302_s13   ;;  %p1750_p0 = scmp.ge.s32.totalorder %s2302_s13, 1  ;;  %s2302_s13 = sphi %s2361_s13, %s20_s13  }
   0x2   : > { %p322_p1 = scmp.lt.s32.totalorder %s2302_s13, 3 }
   0x4   : > { %p323_p2 = pnand %p1750_p0, %p322_p1 }
   0x5   : > { %p365_p3 = scmp.lt.s32.totalorder (!%p323_p2), %s1746_s14, 1 }
   0x6   : > { %326 = sbr.rel (%p323_p2) target bundleno = 934 (0x3a6), region = 60 }
   0xb   : > { %v1764_v0 = vld [vmem:[%s2923_s2 + $0x78] sm:$0xff]  ;;  %v2304_v2 = vmov 0.0   ;;  %v1763_v3 = vld [vmem:[%s2923_s2 + $0x70] sm:$0xff]  ;;  %vm380_vm0 = vcmask 517120   ;;  %s2933_s14 = smov (!%p365_p3, %s1746_s14), 1  ;;  %v1762_v5 = vld [vmem:[%s2923_s2 + $0x68] sm:$0xff] }
   0xc   : > { %v406_v1 = vld [vmem:[%s2923_s2 + $0x38] sm:$0xff]  ;;  %1988 = vmatprep.subr.mxu0 %v2304_v2  ;;  %2019 = vmatprep.subr.mxu1 %v2304_v2  ;;  %v405_v4 = vld [vmem:[%s2923_s2 + $0x30] sm:$0xff]  ;;  %381 = vst.msk [vmem:[#allocation2] sm:$0x3] %vm380_vm0, %v2304_v2  ;;  %382 = vst.msk [vmem:[#allocation2 + $0x12] sm:$0x3] %vm380_vm0, %v2304_v2 }
   0xd   : > { %1989 = vmatpush3.msra.mxu0 %v1764_v0  ;;  %2020 = vmatpush3.msra.mxu1 %v406_v1  ;;  %383 = vst.msk [vmem:[#allocation2 + $0x14] sm:$0x3] %vm380_vm0, %v2304_v2  ;;  %384 = vst.msk [vmem:[#allocation2 + $0x26] sm:$0x3] %vm380_vm0, %v2304_v2  ;;  %v404_v6 = vld [vmem:[%s2923_s2 + $0x28] sm:$0xff]  ;;  %s2395_s27 = sshll.u32 %s2933_s14, 4 }
   0xe   : > { %1990 = vmatprep.subr.mxu0 %v2304_v2  ;;  %2021 = vmatprep.subr.mxu1 %v2304_v2  ;;  %vm387_vm1 = vcmask 523264   ;;  %v1761_v7 = vld [vmem:[%s2923_s2 + $0x60] sm:$0xff]  ;;  %s369_s14 = scalar_lea.vmem %s2921_s0, %s2395_s27  ;;  %s374_s18 = scalar_lea.vmem %s2922_s1, %s2395_s27  ;;  %v1760_v11 = vld [vmem:[%s2923_s2 + $0x58] sm:$0xff]  ;;  %v1759_v15 = vld [vmem:[%s2923_s2 + $0x50] sm:$0xff]  ;;  %vm2305_vm2 = vmmov 0   ;;  %vm772_vm3 = vcmask 523265  }
   0xf   : > { %1991 = vmatpush3.msra.mxu0 %v1763_v3  ;;  %2022 = vmatpush3.msra.mxu1 %v405_v4  ;;  %v403_v8 = vld [vmem:[%s2923_s2 + $0x20] sm:$0xff]  ;;  %v386_v10 = vld [vmem:[%s369_s14 + $0x8] sm:$0xff]  ;;  %v402_v12 = vld [vmem:[%s2923_s2 + $0x18] sm:$0xff]  ;;  %vm775_vm4 = vcmask 516096   ;;  %vm777_vm5 = vcmask 523269   ;;  %vm780_vm6 = vcmask 520192   ;;  %s379_s30 = scalar_lea.vmem %s2931_s10, %s2395_s27 }
  0x10   : > { %1992 = vmatprep.subr.mxu0 %v2304_v2  ;;  %2023 = vmatprep.subr.mxu1 %v2304_v2  ;;  %v385_v9 = vld [vmem:[%s369_s14] sm:$0xff]  ;;  %389 = vst.msk [vmem:[#allocation2 + $0xa] sm:$0xff] %vm387_vm1, %v386_v10  ;;  %v391_v14 = vld [vmem:[%s374_s18 + $0x8] sm:$0xff]  ;;  %v401_v16 = vld [vmem:[%s2923_s2 + $0x10] sm:$0xff]  ;;  %vm1557_vm7 = vcmask 1043456   ;;  %vm1590_vm8 = vcmask 1046528  }
  0x11   : > { %1993 = vmatpush3.msra.mxu0 %v1762_v5  ;;  %2024 = vmatpush3.msra.mxu1 %v404_v6  ;;  %388 = vst.msk [vmem:[#allocation2 + $0x2] sm:$0xff] %vm387_vm1, %v385_v9  ;;  %v390_v13 = vld [vmem:[%s374_s18] sm:$0xff]  ;;  %393 = vst.msk [vmem:[#allocation2 + $0x1e] sm:$0xff] %vm387_vm1, %v391_v14  ;;  %v1758_v17 = vld [vmem:[%s2923_s2 + $0x48] sm:$0xff] }
  0x12   : > { %1994 = vmatprep.subr.mxu0 %v2304_v2  ;;  %2025 = vmatprep.subr.mxu1 %v2304_v2  ;;  %392 = vst.msk [vmem:[#allocation2 + $0x16] sm:$0xff] %vm387_vm1, %v390_v13  ;;  %v400_v18 = vld [vmem:[%s2923_s2 + $0x8] sm:$0xff]  ;;  %v1757_v19 = vld [vmem:[%s2923_s2 + $0x40] sm:$0xff]  ;;  %v1782_v23 = vld [vmem:[%s2923_s2 + $0xb8] sm:$0xff] }
  0x13   : > { %1995 = vmatpush3.msra.mxu0 %v1761_v7  ;;  %2026 = vmatpush3.msra.mxu1 %v403_v8  ;;  %v399_v21 = vld [vmem:[%s2923_s2] sm:$0xff]  ;;  %v1781_v25 = vld [vmem:[%s2923_s2 + $0xb0] sm:$0xff]  ;;  %v1780_v27 = vld [vmem:[%s2923_s2 + $0xa8] sm:$0xff] }
  0x14   : > { %1996 = vmatprep.subr.mxu0 %v2304_v2  ;;  %2027 = vmatprep.subr.mxu1 %v2304_v2  ;;  %v1779_v29 = vld [vmem:[%s2923_s2 + $0xa0] sm:$0xff]  ;;  %v1778_v31 = vld [vmem:[%s2923_s2 + $0x98] sm:$0xff]  ;;  %v1777_v33 = vld [vmem:[%s2923_s2 + $0x90] sm:$0xff] }
  0x15   : > { %1997 = vmatpush3.msra.mxu0 %v1760_v11  ;;  %2028 = vmatpush3.msra.mxu1 %v402_v12  ;;  %v1776_v35 = vld [vmem:[%s2923_s2 + $0x88] sm:$0xff]  ;;  %v1775_v37 = vld [vmem:[%s2923_s2 + $0x80] sm:$0xff]  ;;  %v1796_v44 = vld [vmem:[%s2924_s3 + $0x78] sm:$0xff] }
  0x16   : > { %1998 = vmatprep.subr.mxu0 %v2304_v2  ;;  %2029 = vmatprep.subr.mxu1 %v2304_v2  ;;  %v1795_v45 = vld [vmem:[%s2924_s3 + $0x70] sm:$0xff]  ;;  %v794_v46 = vld [vmem:[%s2924_s3 + $0x38] sm:$0xff]  ;;  %v1794_v48 = vld [vmem:[%s2924_s3 + $0x68] sm:$0xff] }
  0x17   : > { %1999 = vmatpush3.msra.mxu0 %v1759_v15  ;;  %2030 = vmatpush3.msra.mxu1 %v401_v16  ;;  %v632_v40 = vld [vmem:[#allocation2 + $0xa] sm:$0xff]  ;;  %v1793_v50 = vld [vmem:[%s2924_s3 + $0x60] sm:$0xff]  ;;  %v1792_v52 = vld [vmem:[%s2924_s3 + $0x58] sm:$0xff] }
  0x18   : > { %2000 = vmatprep.subr.mxu0 %v2304_v2  ;;  %2031 = vmatprep.subr.mxu1 %v2304_v2  ;;  %v407_v20 = vld [vmem:[#allocation2 + $0x1] sm:$0xff]  ;;  %v408_v24 = vld [vmem:[#allocation2 + $0x9] sm:$0xff]  ;;  %v790_v53 = vld [vmem:[%s2924_s3 + $0x18] sm:$0xff] }
  0x19   : > { %2001 = vmatpush3.msra.mxu0 %v1758_v17  ;;  %2032 = vmatpush3.msra.mxu1 %v400_v18  ;;  %v394_v22 = vld [vmem:[#allocation2] sm:$0xff]  ;;  %v395_v26 = vld [vmem:[#allocation2 + $0x8] sm:$0xff]  ;;  %v409_v28 = vld [vmem:[#allocation2 + $0x11] sm:$0xff] }
  0x1a   : > { %2002 = vmatprep.subr.mxu0 %v2304_v2  ;;  %2004 = vmatprep.mubr.msk.f32.mxu0 %vm2305_vm2, %v2304_v2  ;;  %v396_v30 = vld [vmem:[#allocation2 + $0x10] sm:$0xff]  ;;  %v410_v32 = vld [vmem:[#allocation2 + $0x19] sm:$0xff]  ;;  %v411_v36 = vld [vmem:[#allocation2 + $0x21] sm:$0x3f] }
  0x1b   : > { %2003 = vmatpush3.msra.mxu0 %v1757_v19  ;;  %2033 = vmatprep.subr.mxu1 %v2304_v2  ;;  %v397_v34 = vld [vmem:[#allocation2 + $0x18] sm:$0xff]  ;;  %v398_v38 = vld [vmem:[#allocation2 + $0x20] sm:$0x3f]  ;;  %v793_v47 = vld [vmem:[%s2924_s3 + $0x30] sm:$0xff] }
  0x1c   : > { %2005 = vmatmul.mubr.msk.f32.vlgmr.msra.gmra.mxu0 %vm387_vm1, %v407_v20  ;;  %2034 = vmatpush3.msra.mxu1 %v399_v21  ;;  %v631_v39 = vld [vmem:[#allocation2 + $0x2] sm:$0xff]  ;;  %v633_v41 = vld [vmem:[#allocation2 + $0x12] sm:$0xff]  ;;  %v634_v42 = vld [vmem:[#allocation2 + $0x1a] sm:$0xff] }
  0x1d   : > { %2035 = vmatprep.mubr.msk.f32.mxu1 %vm2305_vm2, %v2304_v2  ;;  %2050 = vmatprep.subr.mxu0 %v2304_v2  ;;  %v635_v43 = vld [vmem:[#allocation2 + $0x22] sm:$0x3f]  ;;  %v792_v49 = vld [vmem:[%s2924_s3 + $0x28] sm:$0xff]  ;;  %v1791_v54 = vld [vmem:[%s2924_s3 + $0x50] sm:$0xff] }
  0x1e   : > { %2036 = vmatmul.mubr.msk.f32.vlgmr.msra.gmra.mxu1 %vm387_vm1, %v394_v22  ;;  %2051 = vmatpush3.msra.mxu0 %v1782_v23  ;;  %v791_v51 = vld [vmem:[%s2924_s3 + $0x20] sm:$0xff]  ;;  %v789_v55 = vld [vmem:[%s2924_s3 + $0x10] sm:$0xff]  ;;  %v1790_v56 = vld [vmem:[%s2924_s3 + $0x48] sm:$0xff] }
  0x1f   : > { %2007 = vmatprep.mubr.msk.f32.mxu0 %vm2305_vm2, %v2304_v2  ;;  %2052 = vmatprep.subr.mxu0 %v2304_v2  ;;  %v788_v57 = vld [vmem:[%s2924_s3 + $0x8] sm:$0xff]  ;;  %v1789_v58 = vld [vmem:[%s2924_s3 + $0x40] sm:$0xff] }
  0x20   : > { %2008 = vmatmul.mubr.msk.f32.gmra.mxu0 %vm387_vm1, %v408_v24  ;;  %2038 = vmatprep.mubr.msk.f32.mxu1 %vm2305_vm2, %v2304_v2  ;;  %v787_v59 = vld [vmem:[%s2924_s3] sm:$0xff] }
  0x21   : > { %2053 = vmatpush3.msra.mxu0 %v1781_v25  ;;  %2010 = vmatprep.mubr.msk.f32.mxu0 %vm2305_vm2, %v2304_v2  ;;  %v1788_v18 = vld [vmem:[%s2926_s5] ss:$0 sm:$0xff] }
  0x22   : > { %2039 = vmatmul.mubr.msk.f32.gmra.mxu1 %vm387_vm1, %v395_v26  ;;  %2054 = vmatprep.subr.mxu0 %v2304_v2 }
  0x23   : > { %2055 = vmatpush3.msra.mxu0 %v1780_v27  ;;  %2041 = vmatprep.mubr.msk.f32.mxu1 %vm2305_vm2, %v2304_v2 }
  0x24   : > { %2011 = vmatmul.mubr.msk.f32.gmra.mxu0 %vm387_vm1, %v409_v28  ;;  %2056 = vmatprep.subr.mxu0 %v2304_v2 }
  0x25   : > { %2057 = vmatpush3.msra.mxu0 %v1779_v29  ;;  %2013 = vmatprep.mubr.msk.f32.mxu0 %vm2305_vm2, %v2304_v2 }
  0x26   : > { %2042 = vmatmul.mubr.msk.f32.gmra.mxu1 %vm387_vm1, %v396_v30  ;;  %2058 = vmatprep.subr.mxu0 %v2304_v2 }
  0x27   : > { %2059 = vmatpush3.msra.mxu0 %v1778_v31  ;;  %2044 = vmatprep.mubr.msk.f32.mxu1 %vm2305_vm2, %v2304_v2 }
  0x28   : > { %2014 = vmatmul.mubr.msk.f32.gmra.mxu0 %vm387_vm1, %v410_v32  ;;  %2060 = vmatprep.subr.mxu0 %v2304_v2 }
  0x29   : > { %2061 = vmatpush3.msra.mxu0 %v1777_v33  ;;  %2016 = vmatprep.mubr.msk.f32.mxu0 %vm2305_vm2, %v2304_v2 }
  0x2a   : > { %2045 = vmatmul.mubr.msk.f32.gmra.mxu1 %vm387_vm1, %v397_v34  ;;  %2062 = vmatprep.subr.mxu0 %v2304_v2 }
  0x2b   : > { %2047 = vmatprep.mubr.msk.f32.mxu1 %vm2305_vm2, %v2304_v2  ;;  %2063 = vmatpush3.msra.mxu0 %v1776_v35 }
  0x2c   : > { %2017 = vmatmul.mubr.msk.f32.gmra.mxu0 %vm387_vm1, %v411_v36  ;;  %2064 = vmatprep.subr.mxu0 %v2304_v2 }
  0x2d   : > { %2065 = vmatpush3.msra.mxu0 %v1775_v37  ;;  %2066 = vmatprep.mubr.msk.f32.mxu0 %vm2305_vm2, %v2304_v2 }
  0x2e   : > { %2048 = vmatmul.mubr.msk.f32.gmra.mxu1 %vm387_vm1, %v398_v38  ;;  %2081 = vmatprep.subr.mxu1 %v2304_v2 }
  0x2f   : > { %2112 = vmatprep.subr.mxu0 %v2304_v2  ;;  %2097 = vmatprep.mubr.msk.f32.mxu1 %vm2305_vm2, %v2304_v2 }
  0x30   : > { %2067 = vmatmul.mubr.msk.f32.vlgmr.msra.gmra.mxu0 %vm387_vm1, %v631_v39  ;;  %2082 = vmatpush3.msra.mxu1 %v1796_v44  ;;  %v1814_v39 = vld [vmem:[%s2924_s3 + $0xb8] sm:$0xff] }
  0x31   : > { %2069 = vmatprep.mubr.msk.f32.mxu0 %vm2305_vm2, %v2304_v2  ;;  %2083 = vmatprep.subr.mxu1 %v2304_v2 }
  0x32   : > { %2084 = vmatpush3.msra.mxu1 %v1795_v45  ;;  %2113 = vmatpush3.msra.mxu0 %v794_v46  ;;  %v1813_v45 = vld [vmem:[%s2924_s3 + $0xb0] sm:$0xff] }
  0x33   : > { %2085 = vmatprep.subr.mxu1 %v2304_v2  ;;  %2114 = vmatprep.subr.mxu0 %v2304_v2 }
  0x34   : > { %2070 = vmatmul.mubr.msk.f32.gmra.mxu0 %vm387_vm1, %v632_v40  ;;  %2086 = vmatpush3.msra.mxu1 %v1794_v48 }
  0x35   : > { %2072 = vmatprep.mubr.msk.f32.mxu0 %vm2305_vm2, %v2304_v2  ;;  %2115 = vmatpush3.msra.mxu0 %v793_v47 }
  0x36   : > { %2116 = vmatprep.subr.mxu0 %v2304_v2  ;;  %2087 = vmatprep.subr.mxu1 %v2304_v2 }
  0x37   : > { %2117 = vmatpush3.msra.mxu0 %v792_v49  ;;  %2088 = vmatpush3.msra.mxu1 %v1793_v50 }
  0x38   : > { %2073 = vmatmul.mubr.msk.f32.gmra.mxu0 %vm387_vm1, %v633_v41  ;;  %2118 = vmatprep.subr.mxu0 %v2304_v2 }
  0x39   : > { %2075 = vmatprep.mubr.msk.f32.mxu0 %vm2305_vm2, %v2304_v2  ;;  %2119 = vmatpush3.msra.mxu0 %v791_v51 }
  0x3a   : > { %2089 = vmatprep.subr.mxu1 %v2304_v2  ;;  %2120 = vmatprep.subr.mxu0 %v2304_v2 }
  0x3b   : > { %2090 = vmatpush3.msra.mxu1 %v1792_v52  ;;  %2121 = vmatpush3.msra.mxu0 %v790_v53  ;;  %v1812_v52 = vld [vmem:[%s2924_s3 + $0xa8] sm:$0xff] }
  0x3c   : > { %2076 = vmatmul.mubr.msk.f32.gmra.mxu0 %vm387_vm1, %v634_v42  ;;  %2091 = vmatprep.subr.mxu1 %v2304_v2 }
  0x3d   : > { %2078 = vmatprep.mubr.msk.f32.mxu0 %vm2305_vm2, %v2304_v2  ;;  %2122 = vmatprep.subr.mxu0 %v2304_v2 }
  0x3e   : > { %2092 = vmatpush3.msra.mxu1 %v1791_v54  ;;  %2123 = vmatpush3.msra.mxu0 %v789_v55  ;;  %v1811_v55 = vld [vmem:[%s2924_s3 + $0xa0] sm:$0xff] }
  0x3f   : > { %2093 = vmatprep.subr.mxu1 %v2304_v2  ;;  %2124 = vmatprep.subr.mxu0 %v2304_v2 }
  0x40   : > { %2079 = vmatmul.mubr.msk.f32.gmra.mxu0 %vm387_vm1, %v635_v43  ;;  %2094 = vmatpush3.msra.mxu1 %v1790_v56 }
  0x41   : > { %2128 = vmatprep.mubr.msk.f32.mxu0 %vm2305_vm2, %v2304_v2  ;;  %2125 = vmatpush3.msra.mxu0 %v788_v57 }
  0x42   : > { %2095 = vmatprep.subr.mxu1 %v2304_v2  ;;  %2126 = vmatprep.subr.mxu0 %v2304_v2 }
  0x43   : > { %2096 = vmatpush3.msra.mxu1 %v1789_v58  ;;  %2127 = vmatpush3.msra.mxu0 %v787_v59  ;;  %v1810_v58 = vld [vmem:[%s2924_s3 + $0x98] sm:$0xff] }
  0x44   : > { %2143 = vmatprep.subr.mxu1 %v2304_v2  ;;  %2174 = vmatprep.subr.mxu0 %v2304_v2 }
  0xdc   : > { %v502_v60 = vpop.f32.mrf.mxu0 }
  0xde   : > { %v607_v61 = vpop.f32.mrf.mxu1  ;;  %v2006_v62 = vpop.f32.mrf.mxu0 }
  0xdf   : > { %v608_v16 = vadd.f32 %v607_v61, %v502_v60  ;;  %v1809_v61 = vld [vmem:[%s2924_s3 + $0x90] sm:$0xff]  ;;  %v1808_v62 = vld [vmem:[%s2924_s3 + $0x88] sm:$0xff] }
  0xe0   : > { %v2037_v63 = vpop.f32.mrf.mxu1  ;;  %v507_v0 = vpop.f32.mrf.mxu0 }
  0xe2   : > { %v612_v1 = vpop.f32.mrf.mxu1  ;;  %v2009_v3 = vpop.f32.mrf.mxu0 }
  0xe3   : > { %v613_v22 = vadd.f32 %v612_v1, %v507_v0  ;;  %v1807_v1 = vld [vmem:[%s2924_s3 + $0x80] sm:$0xff] }
  0xe4   : > { %v2040_v4 = vpop.f32.mrf.mxu1  ;;  %v512_v5 = vpop.f32.mrf.mxu0 }
  0xe6   : > { %v617_v6 = vpop.f32.mrf.mxu1  ;;  %v2012_v7 = vpop.f32.mrf.mxu0 }
  0xe7   : > { %v618_v28 = vadd.f32 %v617_v6, %v512_v5 }
  0xe8   : > { %v2043_v8 = vpop.f32.mrf.mxu1  ;;  %v517_v9 = vpop.f32.mrf.mxu0 }
  0xe9   : > { %v1828_v8 = vld [vmem:[%s2925_s4 + $0x78] sm:$0xff] }
  0xea   : > { %v622_v10 = vpop.f32.mrf.mxu1  ;;  %v2015_v11 = vpop.f32.mrf.mxu0 }
  0xeb   : > { %v623_v34 = vadd.f32 %v622_v10, %v517_v9  ;;  %v1183_v9 = vld [vmem:[%s2925_s4 + $0x38] sm:$0xff]  ;;  %v1827_v10 = vld [vmem:[%s2925_s4 + $0x70] sm:$0xff] }
  0xec   : > { %v2046_v12 = vpop.f32.mrf.mxu1  ;;  %v522_v13 = vpop.f32.mrf.mxu0  ;;  %v1182_v11 = vld [vmem:[%s2925_s4 + $0x30] sm:$0xff] }
  0xed   : > { %v1826_v12 = vld [vmem:[%s2925_s4 + $0x68] sm:$0xff] }
  0xee   : > { %v627_v14 = vpop.f32.mrf.mxu1  ;;  %v2018_v15 = vpop.f32.mrf.mxu0 }
  0xef   : > { %v628_v43 = vadd.f32 %v627_v14, %v522_v13  ;;  %v1181_v13 = vld [vmem:[%s2925_s4 + $0x28] sm:$0xff]  ;;  %v1825_v14 = vld [vmem:[%s2925_s4 + $0x60] sm:$0xff] }
  0xf0   : > { %v726_v17 = vpop.f32.mrf.mxu0  ;;  %v2049_v19 = vpop.f32.mrf.mxu1  ;;  %v1180_v15 = vld [vmem:[%s2925_s4 + $0x20] sm:$0xff] }
  0xf1   : > { %v750_v20 = vadd.f32 %v726_v17, %v608_v16  ;;  %v1824_v16 = vld [vmem:[%s2925_s4 + $0x58] sm:$0xff]  ;;  %v1178_v19 = vld [vmem:[%s2925_s4 + $0x10] sm:$0xff] }
  0xf2   : > { %v2068_v21 = vpop.f32.mrf.mxu0  ;;  %v1179_v17 = vld [vmem:[%s2925_s4 + $0x18] sm:$0xff] }
  0xf3   : > { %v2601_v23 = vadd.f32 %v1788_v18, %v750_v20  ;;  %v1822_v20 = vld [vmem:[%s2925_s4 + $0x48] sm:$0xff] }
  0xf4   : > { %v731_v24 = vpop.f32.mrf.mxu0  ;;  %v1177_v21 = vld [vmem:[%s2925_s4 + $0x8] sm:$0xff] }
  0xf5   : > { %v767_v25 = vmax.f32 %v2601_v23, 0.0  ;;  %v751_v26 = vadd.f32 %v731_v24, %v613_v22  ;;  %v1821_v22 = vld [vmem:[%s2925_s4 + $0x40] sm:$0xff] }
  0xf6   : > { %v2071_v27 = vpop.f32.mrf.mxu0  ;;  %v1176_v24 = vld [vmem:[%s2925_s4] sm:$0xff] }
  0xf7   : > { %773 = vst.msk [vmem:[#allocation2 + $0x1] sm:$0xfe] %vm772_vm3, %v767_v25  ;;  %v2607_v29 = vadd.f32 %v1788_v18, %v751_v26 }
  0xf8   : > { %v736_v30 = vpop.f32.mrf.mxu0 }
  0xf9   : > { %v768_v31 = vmax.f32 %v2607_v29, 0.0  ;;  %v752_v32 = vadd.f32 %v736_v30, %v618_v28 }
  0xfa   : > { %v2074_v33 = vpop.f32.mrf.mxu0 }
  0xfb   : > { %774 = vst.msk [vmem:[#allocation2 + $0x9] sm:$0xff] %vm387_vm1, %v768_v31  ;;  %v764_v35 = vadd.f32 %v1788_v18, %v752_v32 }
  0xfc   : > { %v741_v36 = vpop.f32.mrf.mxu0 }
  0xfd   : > { %v2613_v37 = vmax.f32 %v764_v35, 0.0  ;;  %v753_v38 = vadd.f32 %v741_v36, %v623_v34 }
  0xfe   : > { %v2077_v40 = vpop.f32.mrf.mxu0  ;;  %v795_v41 = vld [vmem:[#allocation2 + $0x1] sm:$0xff] }
  0xff   : > { %v782_v42 = vld [vmem:[#allocation2] sm:$0xff]  ;;  %776 = vst.msk [vmem:[#allocation2 + $0x11] sm:$0x1] %vm775_vm4, %v2613_v37  ;;  %v2622_v44 = vadd.f32 %v1788_v18, %v753_v38  ;;  %2098 = vmatmul.mubr.msk.f32.vlgmr.msra.gmra.mxu1 %vm387_vm1, %v795_v41 }
 0x100   : > { %778 = vst.msk [vmem:[#allocation2 + $0x11] sm:$0xe0] %vm777_vm5, %v2613_v37  ;;  %2129 = vmatmul.mubr.msk.f32.vlgmr.msra.gmra.mxu0 %vm387_vm1, %v782_v42  ;;  %v746_v46 = vpop.f32.mrf.mxu0  ;;  %2144 = vmatpush3.msra.mxu1 %v1814_v39 }
 0x101   : > { %2100 = vmatprep.mubr.msk.f32.mxu1 %vm2305_vm2, %v2304_v2  ;;  %v770_v47 = vmax.f32 %v2622_v44, 0.0  ;;  %v754_v48 = vadd.f32 %v746_v46, %v628_v43  ;;  %2131 = vmatprep.mubr.msk.f32.mxu0 %vm2305_vm2, %v2304_v2 }
 0x102   : > { %2145 = vmatprep.subr.mxu1 %v2304_v2  ;;  %v2080_v49 = vpop.f32.mrf.mxu0  ;;  %v796_v50 = vld [vmem:[#allocation2 + $0x9] sm:$0xff]  ;;  %2175 = vmatpush3.msra.mxu0 %v1828_v8 }
 0x103   : > { %v783_v51 = vld [vmem:[#allocation2 + $0x8] sm:$0xff]  ;;  %2146 = vmatpush3.msra.mxu1 %v1813_v45  ;;  %779 = vst.msk [vmem:[#allocation2 + $0x19] sm:$0xff] %vm387_vm1, %v770_v47  ;;  %v2641_v53 = vadd.f32 %v1788_v18, %v754_v48  ;;  %2176 = vmatprep.subr.mxu0 %v2304_v2  ;;  %v1823_v18 = vld [vmem:[%s2925_s4 + $0x50] sm:$0xff] }
 0x104   : > { %2101 = vmatmul.mubr.msk.f32.gmra.mxu1 %vm387_vm1, %v796_v50  ;;  %2132 = vmatmul.mubr.msk.f32.gmra.mxu0 %vm387_vm1, %v783_v51  ;;  %v1019_v3 = vld [vmem:[#allocation2 + $0x2] sm:$0xff] }
 0x105   : > { %2147 = vmatprep.subr.mxu1 %v2304_v2  ;;  %2103 = vmatprep.mubr.msk.f32.mxu1 %vm2305_vm2, %v2304_v2  ;;  %v771_v54 = vmax.f32 %v2641_v53, 0.0  ;;  %v1842_v53 = vld [vmem:[%s2925_s4 + $0x98] sm:$0xff] }
 0x106   : > { %2148 = vmatpush3.msra.mxu1 %v1812_v52  ;;  %2134 = vmatprep.mubr.msk.f32.mxu0 %vm2305_vm2, %v2304_v2  ;;  %v1020_v4 = vld [vmem:[#allocation2 + $0xa] sm:$0xff] }
 0x107   : > { %v797_v56 = vld [vmem:[#allocation2 + $0x11] sm:$0xff]  ;;  %2149 = vmatprep.subr.mxu1 %v2304_v2  ;;  %781 = vst.msk [vmem:[#allocation2 + $0x21] sm:$0x1f] %vm780_vm6, %v771_v54  ;;  %2177 = vmatpush3.msra.mxu0 %v1827_v10 }
 0x108   : > { %v784_v57 = vld [vmem:[#allocation2 + $0x10] sm:$0xff]  ;;  %2104 = vmatmul.mubr.msk.f32.gmra.mxu1 %vm387_vm1, %v797_v56  ;;  %2178 = vmatprep.subr.mxu0 %v2304_v2 }
 0x109   : > { %2135 = vmatmul.mubr.msk.f32.gmra.mxu0 %vm387_vm1, %v784_v57  ;;  %2150 = vmatpush3.msra.mxu1 %v1811_v55  ;;  %v1820_v55 = vld [vmem:[%s2927_s6] ss:$0 sm:$0xff] }
 0x10a   : > { %2106 = vmatprep.mubr.msk.f32.mxu1 %vm2305_vm2, %v2304_v2  ;;  %2151 = vmatprep.subr.mxu1 %v2304_v2  ;;  %v798_v59 = vld [vmem:[#allocation2 + $0x19] sm:$0xff] }
 0x10b   : > { %2137 = vmatprep.mubr.msk.f32.mxu0 %vm2305_vm2, %v2304_v2  ;;  %2152 = vmatpush3.msra.mxu1 %v1810_v58  ;;  %v785_v60 = vld [vmem:[#allocation2 + $0x18] sm:$0xff] }
 0x10c   : > { %2107 = vmatmul.mubr.msk.f32.gmra.mxu1 %vm387_vm1, %v798_v59  ;;  %2153 = vmatprep.subr.mxu1 %v2304_v2  ;;  %v1021_v5 = vld [vmem:[#allocation2 + $0x12] sm:$0xff] }
 0x10d   : > { %2138 = vmatmul.mubr.msk.f32.gmra.mxu0 %vm387_vm1, %v785_v60  ;;  %2109 = vmatprep.mubr.msk.f32.mxu1 %vm2305_vm2, %v2304_v2 }
 0x10e   : > { %2154 = vmatpush3.msra.mxu1 %v1809_v61  ;;  %2140 = vmatprep.mubr.msk.f32.mxu0 %vm2305_vm2, %v2304_v2  ;;  %v799_v63 = vld [vmem:[#allocation2 + $0x21] sm:$0x3f] }
 0x10f   : > { %2155 = vmatprep.subr.mxu1 %v2304_v2  ;;  %v786_v0 = vld [vmem:[#allocation2 + $0x20] sm:$0x3f]  ;;  %2179 = vmatpush3.msra.mxu0 %v1826_v12 }
 0x110   : > { %2110 = vmatmul.mubr.msk.f32.gmra.mxu1 %vm387_vm1, %v799_v63  ;;  %v1022_v6 = vld [vmem:[#allocation2 + $0x1a] sm:$0xff]  ;;  %v1023_v7 = vld [vmem:[#allocation2 + $0x22] sm:$0x3f]  ;;  %2180 = vmatprep.subr.mxu0 %v2304_v2 }
 0x111   : > { %2141 = vmatmul.mubr.msk.f32.gmra.mxu0 %vm387_vm1, %v786_v0  ;;  %2156 = vmatpush3.msra.mxu1 %v1808_v62 }
 0x112   : > { %2159 = vmatprep.mubr.msk.f32.mxu1 %vm2305_vm2, %v2304_v2  ;;  %2157 = vmatprep.subr.mxu1 %v2304_v2 }
 0x113   : > { %2190 = vmatprep.mubr.msk.f32.mxu0 %vm2305_vm2, %v2304_v2  ;;  %2158 = vmatpush3.msra.mxu1 %v1807_v1 }
 0x114   : > { %2160 = vmatmul.mubr.msk.f32.vlgmr.msra.gmra.mxu1 %vm387_vm1, %v1019_v3  ;;  %2205 = vmatprep.subr.mxu1 %v2304_v2 }
 0x115   : > { %2162 = vmatprep.mubr.msk.f32.mxu1 %vm2305_vm2, %v2304_v2  ;;  %2206 = vmatpush3.msra.mxu1 %v1183_v9 }
 0x116   : > { %2207 = vmatprep.subr.mxu1 %v2304_v2  ;;  %2181 = vmatpush3.msra.mxu0 %v1825_v14 }
 0x117   : > { %2208 = vmatpush3.msra.mxu1 %v1182_v11  ;;  %2182 = vmatprep.subr.mxu0 %v2304_v2 }
 0x118   : > { %2163 = vmatmul.mubr.msk.f32.gmra.mxu1 %vm387_vm1, %v1020_v4  ;;  %2209 = vmatprep.subr.mxu1 %v2304_v2 }
 0x119   : > { %2165 = vmatprep.mubr.msk.f32.mxu1 %vm2305_vm2, %v2304_v2  ;;  %2210 = vmatpush3.msra.mxu1 %v1181_v13 }
 0x11a   : > { %2211 = vmatprep.subr.mxu1 %v2304_v2  ;;  %2183 = vmatpush3.msra.mxu0 %v1824_v16  ;;  %v1846_v16 = vld [vmem:[%s2925_s4 + $0xb8] sm:$0xff] }
 0x11b   : > { %2212 = vmatpush3.msra.mxu1 %v1180_v15  ;;  %2184 = vmatprep.subr.mxu0 %v2304_v2 }
 0x11c   : > { %2166 = vmatmul.mubr.msk.f32.gmra.mxu1 %vm387_vm1, %v1021_v5  ;;  %2213 = vmatprep.subr.mxu1 %v2304_v2 }
 0x11d   : > { %2168 = vmatprep.mubr.msk.f32.mxu1 %vm2305_vm2, %v2304_v2  ;;  %2214 = vmatpush3.msra.mxu1 %v1179_v17 }
 0x11e   : > { %2215 = vmatprep.subr.mxu1 %v2304_v2  ;;  %2185 = vmatpush3.msra.mxu0 %v1823_v18 }
 0x11f   : > { %2216 = vmatpush3.msra.mxu1 %v1178_v19  ;;  %2186 = vmatprep.subr.mxu0 %v2304_v2 }
 0x120   : > { %2169 = vmatmul.mubr.msk.f32.gmra.mxu1 %vm387_vm1, %v1022_v6  ;;  %2217 = vmatprep.subr.mxu1 %v2304_v2 }
 0x121   : > { %2171 = vmatprep.mubr.msk.f32.mxu1 %vm2305_vm2, %v2304_v2  ;;  %2187 = vmatpush3.msra.mxu0 %v1822_v20 }
 0x122   : > { %2218 = vmatpush3.msra.mxu1 %v1177_v21  ;;  %2188 = vmatprep.subr.mxu0 %v2304_v2 }
 0x123   : > { %2219 = vmatprep.subr.mxu1 %v2304_v2  ;;  %2189 = vmatpush3.msra.mxu0 %v1821_v22 }
 0x124   : > { %2172 = vmatmul.mubr.msk.f32.gmra.mxu1 %vm387_vm1, %v1023_v7  ;;  %2236 = vmatprep.subr.mxu0 %v2304_v2 }
 0x125   : > { %2221 = vmatprep.mubr.msk.f32.mxu1 %vm2305_vm2, %v2304_v2  ;;  %2220 = vmatpush3.msra.mxu1 %v1176_v24 }
 0x1bf   : > { %v890_v26 = vpop.f32.mrf.mxu1 }
 0x1c0   : > { %v995_v27 = vpop.f32.mrf.mxu0 }
 0x1c1   : > { %v2099_v28 = vpop.f32.mrf.mxu1  ;;  %v996_v51 = vadd.f32 %v995_v27, %v890_v26  ;;  %v1844_v27 = vld [vmem:[%s2925_s4 + $0xa8] sm:$0xff] }
 0x1c2   : > { %v2130_v30 = vpop.f32.mrf.mxu0 }
 0x1c4   : > { %v895_v32 = vpop.f32.mrf.mxu1  ;;  %v1000_v33 = vpop.f32.mrf.mxu0 }
 0x1c5   : > { %v1001_v58 = vadd.f32 %v1000_v33, %v895_v32 }
 0x1c6   : > { %v2102_v34 = vpop.f32.mrf.mxu1  ;;  %v2133_v35 = vpop.f32.mrf.mxu0 }
 0x1c7   : > { %v1841_v34 = vld [vmem:[%s2925_s4 + $0x90] sm:$0xff]  ;;  %v1840_v35 = vld [vmem:[%s2925_s4 + $0x88] sm:$0xff] }
 0x1c8   : > { %v900_v36 = vpop.f32.mrf.mxu1 }
 0x1c9   : > { %v1005_v38 = vpop.f32.mrf.mxu0 }
 0x1ca   : > { %v2105_v39 = vpop.f32.mrf.mxu1  ;;  %v1006_v0 = vadd.f32 %v1005_v38, %v900_v36 }
 0x1cb   : > { %v2136_v40 = vpop.f32.mrf.mxu0  ;;  %v1839_v39 = vld [vmem:[%s2925_s4 + $0x80] sm:$0xff] }
 0x1cc   : > { %v905_v41 = vpop.f32.mrf.mxu1 }
 0x1cd   : > { %v1010_v42 = vpop.f32.mrf.mxu0 }
 0x1ce   : > { %v2108_v43 = vpop.f32.mrf.mxu1  ;;  %v1011_v8 = vadd.f32 %v1010_v42, %v905_v41 }
 0x1cf   : > { %v2139_v45 = vpop.f32.mrf.mxu0 }
 0x1d0   : > { %v910_v46 = vpop.f32.mrf.mxu1 }
 0x1d1   : > { %v1015_v48 = vpop.f32.mrf.mxu0 }
 0x1d2   : > { %v2111_v49 = vpop.f32.mrf.mxu1  ;;  %v1016_v13 = vadd.f32 %v1015_v48, %v910_v46  ;;  %v1579_v46 = vld [vmem:[%s2929_s8 + $0x38] sm:$0xff]  ;;  %v1578_v48 = vld [vmem:[%s2929_s8 + $0x30] sm:$0xff] }
 0x1d3   : > { %v2142_v50 = vpop.f32.mrf.mxu0  ;;  %2267 = vmatprep.subr.mxu1 %v1579_v46  ;;  %v1577_v49 = vld [vmem:[%s2929_s8 + $0x28] sm:$0xff] }
 0x1d4   : > { %v1114_v52 = vpop.f32.mrf.mxu1  ;;  %v1575_v50 = vld [vmem:[%s2929_s8 + $0x18] sm:$0xff] }
 0x1d5   : > { %v1138_v56 = vadd.f32 %v1114_v52, %v996_v51  ;;  %v1574_v51 = vld [vmem:[%s2929_s8 + $0x10] sm:$0xff]  ;;  %v1573_v52 = vld [vmem:[%s2929_s8 + $0x8] sm:$0xff] }
 0x1d6   : > { %v2161_v57 = vpop.f32.mrf.mxu1 }
 0x1d7   : > { %v1150_v59 = vadd.f32 %v1820_v55, %v1138_v56 }
 0x1d8   : > { %v1119_v60 = vpop.f32.mrf.mxu1 }
 0x1d9   : > { %v1155_v61 = vmax.f32 %v1150_v59, 0.0  ;;  %v1139_v62 = vadd.f32 %v1119_v60, %v1001_v58 }
 0x1da   : > { %v2164_v63 = vpop.f32.mrf.mxu1 }
 0x1db   : > { %v2776_v1 = vadd.f32 %v1155_v61, %v767_v25  ;;  %v1151_v3 = vadd.f32 %v1820_v55, %v1139_v62 }
 0x1dc   : > { %v1124_v4 = vpop.f32.mrf.mxu1 }
 0x1dd   : > { %1165 = vst.msk [vmem:[#allocation2 + $0x1] sm:$0xfe] %vm772_vm3, %v2776_v1  ;;  %v1156_v5 = vmax.f32 %v1151_v3, 0.0  ;;  %v1140_v6 = vadd.f32 %v1124_v4, %v1006_v0 }
 0x1de   : > { %v2167_v7 = vpop.f32.mrf.mxu1 }
 0x1df   : > { %v2782_v9 = vadd.f32 %v1156_v5, %v768_v31  ;;  %v1152_v10 = vadd.f32 %v1820_v55, %v1140_v6 }
 0x1e0   : > { %v1129_v11 = vpop.f32.mrf.mxu1 }
 0x1e1   : > { %1166 = vst.msk [vmem:[#allocation2 + $0x9] sm:$0xff] %vm387_vm1, %v2782_v9  ;;  %v1157_v23 = vmax.f32 %v1152_v10, 0.0  ;;  %v1141_v25 = vadd.f32 %v1129_v11, %v1011_v8 }
 0x1e2   : > { %v2170_v12 = vpop.f32.mrf.mxu1 }
 0x1e3   : > { %v2787_v14 = vadd.f32 %v1157_v23, %v2613_v37  ;;  %v1153_v15 = vadd.f32 %v1820_v55, %v1141_v25  ;;  %v1845_v37 = vld [vmem:[%s2925_s4 + $0xb0] sm:$0xff] }
 0x1e4   : > { %v1134_v29 = vpop.f32.mrf.mxu1  ;;  %v1184_v31 = vld [vmem:[#allocation2 + $0x1] sm:$0xff] }
 0x1e5   : > { %v1171_v17 = vld [vmem:[#allocation2] sm:$0xff]  ;;  %1167 = vst.msk [vmem:[#allocation2 + $0x11] sm:$0x1] %vm775_vm4, %v2787_v14  ;;  %v1158_v18 = vmax.f32 %v1153_v15, 0.0  ;;  %v1142_v19 = vadd.f32 %v1134_v29, %v1016_v13  ;;  %2191 = vmatmul.mubr.msk.f32.vlgmr.msra.gmra.mxu0 %vm387_vm1, %v1184_v31 }
 0x1e6   : > { %1168 = vst.msk [vmem:[#allocation2 + $0x11] sm:$0xe0] %vm777_vm5, %v2787_v14  ;;  %2222 = vmatmul.mubr.msk.f32.vlgmr.msra.gmra.mxu1 %vm387_vm1, %v1171_v17  ;;  %v2173_v20 = vpop.f32.mrf.mxu1  ;;  %2237 = vmatpush3.msra.mxu0 %v1846_v16 }
 0x1e7   : > { %2193 = vmatprep.mubr.msk.f32.mxu0 %vm2305_vm2, %v2304_v2  ;;  %v2805_v21 = vadd.f32 %v1158_v18, %v770_v47  ;;  %v1154_v22 = vadd.f32 %v1820_v55, %v1142_v19  ;;  %2224 = vmatprep.mubr.msk.f32.mxu1 %vm2305_vm2, %v2304_v2  ;;  %v1843_v47 = vld [vmem:[%s2925_s4 + $0xa0] sm:$0xff] }
 0x1e8   : > { %2238 = vmatprep.subr.mxu0 %v2304_v2  ;;  %v1185_v24 = vld [vmem:[#allocation2 + $0x9] sm:$0xff]  ;;  %2268 = vmatpush3.msra.mxu1 %v1579_v46  ;;  %v1572_v55 = vld [vmem:[%s2929_s8] sm:$0xff] }
 0x1e9   : > { %v1172_v26 = vld [vmem:[#allocation2 + $0x8] sm:$0xff]  ;;  %2239 = vmatpush3.msra.mxu0 %v1845_v37  ;;  %1169 = vst.msk [vmem:[#allocation2 + $0x19] sm:$0xff] %vm387_vm1, %v2805_v21  ;;  %v1159_v28 = vmax.f32 %v1154_v22, 0.0  ;;  %2269 = vmatprep.subr.mxu1 %v1578_v48  ;;  %v1852_v20 = vld [vmem:[%s2928_s7] ss:$0 sm:$0xff] }
 0x1ea   : > { %2194 = vmatmul.mubr.msk.f32.gmra.mxu0 %vm387_vm1, %v1185_v24  ;;  %2225 = vmatmul.mubr.msk.f32.gmra.mxu1 %vm387_vm1, %v1172_v26  ;;  %v1408_v40 = vld [vmem:[#allocation2 + $0x2] sm:$0xff] }
 0x1eb   : > { %2240 = vmatprep.subr.mxu0 %v2304_v2  ;;  %2196 = vmatprep.mubr.msk.f32.mxu0 %vm2305_vm2, %v2304_v2  ;;  %v2822_v44 = vadd.f32 %v1159_v28, %v771_v54 }
 0x1ec   : > { %2241 = vmatpush3.msra.mxu0 %v1844_v27  ;;  %2227 = vmatprep.mubr.msk.f32.mxu1 %vm2305_vm2, %v2304_v2  ;;  %v1409_v41 = vld [vmem:[#allocation2 + $0xa] sm:$0xff] }
 0x1ed   : > { %v1186_v30 = vld [vmem:[#allocation2 + $0x11] sm:$0xff]  ;;  %2242 = vmatprep.subr.mxu0 %v2304_v2  ;;  %1170 = vst.msk [vmem:[#allocation2 + $0x21] sm:$0x1f] %vm780_vm6, %v2822_v44  ;;  %2270 = vmatpush3.msra.mxu1 %v1578_v48 }
 0x1ee   : > { %v1173_v32 = vld [vmem:[#allocation2 + $0x10] sm:$0xff]  ;;  %2197 = vmatmul.mubr.msk.f32.gmra.mxu0 %vm387_vm1, %v1186_v30  ;;  %2271 = vmatprep.subr.mxu1 %v1577_v49 }
 0x1ef   : > { %2228 = vmatmul.mubr.msk.f32.gmra.mxu1 %vm387_vm1, %v1173_v32  ;;  %2243 = vmatpush3.msra.mxu0 %v1843_v47 }
 0x1f0   : > { %2199 = vmatprep.mubr.msk.f32.mxu0 %vm2305_vm2, %v2304_v2  ;;  %2244 = vmatprep.subr.mxu0 %v2304_v2  ;;  %v1187_v54 = vld [vmem:[#allocation2 + $0x19] sm:$0xff] }
 0x1f1   : > { %2230 = vmatprep.mubr.msk.f32.mxu1 %vm2305_vm2, %v2304_v2  ;;  %2245 = vmatpush3.msra.mxu0 %v1842_v53  ;;  %v1174_v33 = vld [vmem:[#allocation2 + $0x18] sm:$0xff] }
 0x1f2   : > { %2200 = vmatmul.mubr.msk.f32.gmra.mxu0 %vm387_vm1, %v1187_v54  ;;  %2246 = vmatprep.subr.mxu0 %v2304_v2  ;;  %v1410_v42 = vld [vmem:[#allocation2 + $0x12] sm:$0xff] }
 0x1f3   : > { %2231 = vmatmul.mubr.msk.f32.gmra.mxu1 %vm387_vm1, %v1174_v33  ;;  %2202 = vmatprep.mubr.msk.f32.mxu0 %vm2305_vm2, %v2304_v2 }
 0x1f4   : > { %2247 = vmatpush3.msra.mxu0 %v1841_v34  ;;  %2233 = vmatprep.mubr.msk.f32.mxu1 %vm2305_vm2, %v2304_v2  ;;  %v1188_v36 = vld [vmem:[#allocation2 + $0x21] sm:$0x3f] }
 0x1f5   : > { %2248 = vmatprep.subr.mxu0 %v2304_v2  ;;  %v1175_v38 = vld [vmem:[#allocation2 + $0x20] sm:$0x3f]  ;;  %2272 = vmatpush3.msra.mxu1 %v1577_v49 }
 0x1f6   : > { %2203 = vmatmul.mubr.msk.f32.gmra.mxu0 %vm387_vm1, %v1188_v36  ;;  %v1411_v43 = vld [vmem:[#allocation2 + $0x1a] sm:$0xff]  ;;  %v1412_v45 = vld [vmem:[#allocation2 + $0x22] sm:$0x3f] }
 0x1f7   : > { %2234 = vmatmul.mubr.msk.f32.gmra.mxu1 %vm387_vm1, %v1175_v38  ;;  %2249 = vmatpush3.msra.mxu0 %v1840_v35 }
 0x1f8   : > { %2252 = vmatprep.mubr.msk.f32.mxu0 %vm2305_vm2, %v2304_v2  ;;  %2250 = vmatprep.subr.mxu0 %v2304_v2 }
 0x1f9   : > { %2251 = vmatpush3.msra.mxu0 %v1839_v39 }
 0x1fa   : > { %2253 = vmatmul.mubr.msk.f32.vlgmr.msra.gmra.mxu0 %vm387_vm1, %v1408_v40 }
 0x1fb   : > { %2255 = vmatprep.mubr.msk.f32.mxu0 %vm2305_vm2, %v2304_v2 }
 0x1fe   : > { %2256 = vmatmul.mubr.msk.f32.gmra.mxu0 %vm387_vm1, %v1409_v41 }
 0x1ff   : > { %2258 = vmatprep.mubr.msk.f32.mxu0 %vm2305_vm2, %v2304_v2 }
 0x202   : > { %2259 = vmatmul.mubr.msk.f32.gmra.mxu0 %vm387_vm1, %v1410_v42 }
 0x203   : > { %2261 = vmatprep.mubr.msk.f32.mxu0 %vm2305_vm2, %v2304_v2 }
 0x206   : > { %2262 = vmatmul.mubr.msk.f32.gmra.mxu0 %vm387_vm1, %v1411_v43 }
 0x207   : > { %2264 = vmatprep.mubr.msk.f32.mxu0 %vm2305_vm2, %v2304_v2  ;;  %v1576_v2 = vld [vmem:[%s2929_s8 + $0x20] sm:$0xff] }
 0x208   : > { %2273 = vmatprep.subr.mxu1 %v1576_v2 }
 0x209   : > { %2274 = vmatpush3.msra.mxu1 %v1576_v2 }
 0x20a   : > { %2265 = vmatmul.mubr.msk.f32.gmra.mxu0 %vm387_vm1, %v1412_v45  ;;  %2275 = vmatprep.subr.mxu1 %v1575_v50 }
 0x20b   : > { %2276 = vmatpush3.msra.mxu1 %v1575_v50 }
 0x20c   : > { %2277 = vmatprep.subr.mxu1 %v1574_v51 }
 0x20d   : > { %2278 = vmatpush3.msra.mxu1 %v1574_v51 }
 0x20e   : > { %2279 = vmatprep.subr.mxu1 %v1573_v52 }
 0x20f   : > { %2280 = vmatpush3.msra.mxu1 %v1573_v52 }
 0x210   : > { %2281 = vmatprep.subr.mxu1 %v1572_v55 }
 0x211   : > { %2282 = vmatpush3.msra.mxu1 %v1572_v55 }
 0x2a5   : > { %v1279_v56 = vpop.f32.mrf.mxu0 }
 0x2a6   : > { %v1384_v57 = vpop.f32.mrf.mxu1 }
 0x2a7   : > { %v2192_v58 = vpop.f32.mrf.mxu0  ;;  %v1385_v17 = vadd.f32 %v1384_v57, %v1279_v56 }
 0x2a8   : > { %v2223_v59 = vpop.f32.mrf.mxu1 }
 0x2aa   : > { %v1284_v60 = vpop.f32.mrf.mxu0  ;;  %v1389_v61 = vpop.f32.mrf.mxu1 }
 0x2ab   : > { %v1390_v27 = vadd.f32 %v1389_v61, %v1284_v60 }
 0x2ac   : > { %v2195_v62 = vpop.f32.mrf.mxu0  ;;  %v2226_v63 = vpop.f32.mrf.mxu1 }
 0x2ae   : > { %v1289_v0 = vpop.f32.mrf.mxu0 }
 0x2af   : > { %v1394_v3 = vpop.f32.mrf.mxu1 }
 0x2b0   : > { %v2198_v4 = vpop.f32.mrf.mxu0  ;;  %v1395_v31 = vadd.f32 %v1394_v3, %v1289_v0 }
 0x2b1   : > { %v2229_v5 = vpop.f32.mrf.mxu1 }
 0x2b2   : > { %v1294_v6 = vpop.f32.mrf.mxu0 }
 0x2b3   : > { %v1399_v7 = vpop.f32.mrf.mxu1 }
 0x2b4   : > { %v2201_v8 = vpop.f32.mrf.mxu0  ;;  %v1400_v24 = vadd.f32 %v1399_v7, %v1294_v6 }
 0x2b5   : > { %v2232_v10 = vpop.f32.mrf.mxu1 }
 0x2b6   : > { %v1299_v11 = vpop.f32.mrf.mxu0 }
 0x2b7   : > { %v1404_v23 = vpop.f32.mrf.mxu1 }
 0x2b8   : > { %v2204_v25 = vpop.f32.mrf.mxu0  ;;  %v1405_v33 = vadd.f32 %v1404_v23, %v1299_v11 }
 0x2b9   : > { %v2235_v12 = vpop.f32.mrf.mxu1 }
 0x2ba   : > { %v1503_v13 = vpop.f32.mrf.mxu0 }
 0x2bb   : > { %v1527_v37 = vadd.f32 %v1503_v13, %v1385_v17 }
 0x2bc   : > { %v2254_v15 = vpop.f32.mrf.mxu0 }
 0x2bd   : > { %v1539_v32 = vadd.f32 %v1852_v20, %v1527_v37 }
 0x2be   : > { %v1508_v16 = vpop.f32.mrf.mxu0 }
 0x2bf   : > { %v1528_v53 = vadd.f32 %v1508_v16, %v1390_v27  ;;  %v1544_v40 = vmax.f32 %v1539_v32, 0.0 }
 0x2c0   : > { %v2257_v29 = vpop.f32.mrf.mxu0 }
 0x2c1   : > { %v1540_v41 = vadd.f32 %v1852_v20, %v1528_v53  ;;  %v1549_v2 = vadd.f32 %v1544_v40, %v2776_v1 }
 0x2c2   : > { %v1513_v18 = vpop.f32.mrf.mxu0 }
 0x2c3   : > { %v1529_v19 = vadd.f32 %v1513_v18, %v1395_v31  ;;  %v1545_v50 = vmax.f32 %v1540_v41, 0.0 }
 0x2c4   : > { %v2260_v22 = vpop.f32.mrf.mxu0 }
 0x2c5   : > { %v1541_v26 = vadd.f32 %v1852_v20, %v1529_v19  ;;  %v1550_v56 = vadd.f32 %v1545_v50, %v2782_v9  ;;  %v1853_v9 = vld [vmem:[%s2930_s9] ss:$0 sm:$0xff] }
 0x2c6   : > { %v1518_v28 = vpop.f32.mrf.mxu0 }
 0x2c7   : > { %v1546_v47 = vmax.f32 %v1541_v26, 0.0  ;;  %v1530_v30 = vadd.f32 %v1518_v28, %v1400_v24 }
 0x2c8   : > { %v2263_v54 = vpop.f32.mrf.mxu0 }
 0x2c9   : > { %v1542_v34 = vadd.f32 %v1852_v20, %v1530_v30  ;;  %v1551_v36 = vadd.f32 %v1546_v47, %v2787_v14 }
 0x2ca   : > { %v1523_v35 = vpop.f32.mrf.mxu0 }
 0x2cb   : > { %v1547_v38 = vmax.f32 %v1542_v34, 0.0  ;;  %v1531_v39 = vadd.f32 %v1523_v35, %v1405_v33  ;;  %v1558_v46 = vrot.slane %v1551_v36, 4 }
 0x2cc   : > { %v2266_v42 = vpop.f32.mrf.mxu0 }
 0x2cd   : > { %v1552_v43 = vadd.f32 %v1547_v38, %v2805_v21  ;;  %v1543_v45 = vadd.f32 %v1852_v20, %v1531_v39 }
 0x2cf   : > { %v1559_v48 = vrot.slane %v1552_v43, 4  ;;  %v1548_v49 = vmax.f32 %v1543_v45, 0.0 }
 0x2d1   : > { %v1553_v51 = vadd.f32 %v1548_v49, %v2822_v44  ;;  %v1560_v52 = vsel %vm1557_vm7, %v1558_v46, %v1559_v48 }
 0x2d2   : > { %v1566_v55 = vsub.f32 %v1549_v2, %v1560_v52 }
 0x2d3   : > { %v1561_v14 = vrot.slane %v1553_v51, 4 }
 0x2d4   : > { %v1569_v21 = vand.u32 2147483647, %v1566_v55 }
 0x2d5   : > { %v1568_v57 = vsub.f32 %v1551_v36, %v1561_v14  ;;  %v1562_v58 = vsel %vm1557_vm7, %v1559_v48, %v1561_v14 }
 0x2d6   : > { %v1567_v59 = vsub.f32 %v1550_v56, %v1562_v58  ;;  %v1591_v63 = vrot.slane %v1569_v21, 1 }
 0x2d7   : > { %v1571_v60 = vand.u32 2147483647, %v1568_v57 }
 0x2d8   : > { %v1570_v61 = vand.u32 2147483647, %v1567_v59 }
 0x2d9   : > { %v1594_v62 = vrot.slane %v1571_v60, 1 }
 0x2da   : > { %v1592_v0 = vrot.slane %v1570_v61, 1 }
 0x2dc   : > { %v1593_v1 = vsel %vm1590_vm8, %v1591_v63, %v1592_v0  ;;  %v1595_v3 = vsel %vm1590_vm8, %v1592_v0, %v1594_v62 }
 0x2dd   : > { %2283 = vmatprep.mubr.msk.f32.mxu1 %vm387_vm1, %v1593_v1 }
 0x2de   : > { %2284 = vmatmul.mubr.msk.f32.vlgmr.msra.gmra.mxu1 %vm387_vm1, %v1595_v3 }
 0x39e   : > { %v2285_v44 = vpop.f32.mrf.mxu1 }
 0x39f   : > { %v1672_v4 = vadd.f32 %v2285_v44, %v1853_v9 }
 0x3a0   : > { %v1666_v5 = vpop.f32.mrf.mxu1 }
 0x3a1   : > { %v1676_v6 = vmax.f32 %v1672_v4, 0.0  ;;  %v1667_v7 = vadd.f32 %v1853_v9, %v1666_v5 }
 0x3a3   : > { %1678 = vst [vmem:[%s379_s30 + $0x8] sm:$0xff] %v1676_v6  ;;  %v1675_v8 = vmax.f32 %v1667_v7, 0.0 }
 0x3a5   : > { %1677 = vst [vmem:[%s379_s30] sm:$0xff] %v1675_v8 }
 0x3a6 PF: > { %s20_s13 = sadd.s32 1, %s2302_s13  }
 0x3a7   : > { %p17_p4 = scmp.ge.s32.totalorder %s20_s13, 4  }
 0x3a9   :  { %19 = sbr.rel (!%p17_p4) target bundleno = 1 (0x1), region = 99 }

</bundles_post_ra>
